<compile_context>
chip_gen: v6e
topology: v6e:2x2x1
jax: 0.10.0
libtpu: 0.0.40
codegen_flags: <defaults>
</compile_context>

<pallas_src>
import jax
import jax.numpy as jnp
from jax.experimental import pallas as pl
from jax.experimental.pallas import tpu as pltpu

LANE = 128


def _round_up(x, m):
    return ((x + m - 1) // m) * m


def gcn_kernel(idx_ref, src_ref, dst_col_ref, dst_row_ref,
               emb_ref, w1_ref, b1_ref, w2_ref, b2_ref, out_ref):
    """Fused LookUpGCN forward on padded, lane-dense operands.

    idx:     [N_pad, 1]     int32  phoneme index per node (-1 for padding rows)
    src:     [E_pad, 1]     int32  edge source nodes      (-1 for padding edges)
    dst_col: [E_pad, 1]     int32  edge target nodes      (-1 for padding edges)
    dst_row: [1, E_pad]     int32  same targets, row-oriented (avoids transpose)
    emb:     [P_pad, D_pad] bf16   embedding table (zero-padded)
    w1, w2:  [D_pad, D_pad] bf16   GCN linear weights (zero-padded)
    b1, b2:  [1, D_pad]     f32    biases (zero-padded)
    out:     [N_pad, D_pad] f32
    """
    n_pad, _ = out_ref.shape
    p_pad = emb_ref.shape[0]
    e_pad = src_ref.shape[0]
    f32 = jnp.float32
    bf16 = jnp.bfloat16

    # --- fused embedding gather as a one-hot matmul (MXU) --------------------
    phon_iota = jax.lax.broadcasted_iota(jnp.int32, (n_pad, p_pad), 1)
    sel = jnp.where(idx_ref[...] == phon_iota, 1.0, 0.0).astype(bf16)    # [N,P]
    x = jnp.dot(sel, emb_ref[...], preferred_element_type=f32)           # [N,D] f32

    # --- fused dense GCN-normalized adjacency build ---------------------------
    node_iota_l = jax.lax.broadcasted_iota(jnp.int32, (e_pad, n_pad), 1)  # lanes = nodes
    node_iota_s = jax.lax.broadcasted_iota(jnp.int32, (n_pad, e_pad), 0)  # sublanes = nodes
    s_src = jnp.where(src_ref[...] == node_iota_l, 1.0, 0.0)              # [E,N] f32
    s_dst = jnp.where(dst_col_ref[...] == node_iota_l, 1.0, 0.0)          # [E,N] f32
    s_dst_t = jnp.where(dst_row_ref[...] == node_iota_s, 1.0, 0.0)        # [N,E] f32

    # A_cnt[d, s] = multiplicity of edge (s -> d); duplicate edges accumulate,
    # matching PyG's scatter-add message aggregation.
    a_cnt = jnp.dot(s_dst_t.astype(bf16), s_src.astype(bf16),
                    preferred_element_type=f32)                           # [N,N] f32

    # in-degree in both orientations (same values; avoids an in-kernel transpose)
    deg_col = jnp.sum(s_dst_t, axis=1, keepdims=True)                     # [N,1]
    deg_row = jnp.sum(s_dst, axis=0, keepdims=True)                       # [1,N]
    inv_col = jnp.where(deg_col > 0.0,
                        jax.lax.rsqrt(jnp.maximum(deg_col, 1.0)), 0.0)
    inv_row = jnp.where(deg_row > 0.0,
                        jax.lax.rsqrt(jnp.maximum(deg_row, 1.0)), 0.0)
    ahat = (a_cnt * inv_col * inv_row).astype(bf16)                       # [N,N] bf16

    # --- layer 1: h1 = Ahat @ (x W1) + b1 ; residual --------------------------
    xw1 = jnp.dot(x.astype(bf16), w1_ref[...], preferred_element_type=f32)
    h1 = jnp.dot(ahat, xw1.astype(bf16), preferred_element_type=f32) + b1_ref[...]
    x1 = x + h1

    # --- layer 2: h2 = Ahat @ (x1 W2) + b2 ; residual --------------------------
    xw2 = jnp.dot(x1.astype(bf16), w2_ref[...], preferred_element_type=f32)
    h2 = jnp.dot(ahat, xw2.astype(bf16), preferred_element_type=f32) + b2_ref[...]

    out_ref[...] = x1 + h2


def lookup_gcn_forward(phoneme_indices, edge_index, params):
    """Forward pass of LookUpGCN.

    phoneme_indices: int32 [N]
    edge_index:      int32 [2, E]  (row 0 = source nodes, row 1 = target nodes)
    """
    emb = params["embedding"]          # [P, D]
    w1, b1 = params["w1"], params["b1"]
    w2, b2 = params["w2"], params["b2"]

    n = phoneme_indices.shape[0]
    e = edge_index.shape[1]
    p, d = emb.shape
    # Residual connections require embed_dim == hidden_channels == out_channels.
    assert w1.shape == (d, d) and w2.shape == (d, d) and b1.shape[1] == d and b2.shape[1] == d

    n_pad = _round_up(max(n, 8), LANE)
    e_pad = _round_up(max(e, 8), LANE)
    p_pad = _round_up(p, LANE)
    d_pad = _round_up(d, LANE)

    # --- pad index vectors (sentinel -1 => all-zero one-hot row, no contribution)
    idx = jnp.full((n_pad, 1), -1, jnp.int32).at[:n, 0].set(
        phoneme_indices.astype(jnp.int32))
    src = jnp.full((e_pad, 1), -1, jnp.int32).at[:e, 0].set(
        edge_index[0].astype(jnp.int32))
    dst_c = jnp.full((e_pad, 1), -1, jnp.int32).at[:e, 0].set(
        edge_index[1].astype(jnp.int32))
    dst_r = jnp.full((1, e_pad), -1, jnp.int32).at[0, :e].set(
        edge_index[1].astype(jnp.int32))

    # --- zero-pad + bf16-cast parameters (lane-dense, MXU-native dtype) ------
    def pad2(a, rows, cols, dtype):
        return jnp.zeros((rows, cols), dtype).at[:a.shape[0], :a.shape[1]].set(
            a.astype(dtype))

    emb_p = pad2(emb, p_pad, d_pad, jnp.bfloat16)
    w1_p = pad2(w1, d_pad, d_pad, jnp.bfloat16)
    w2_p = pad2(w2, d_pad, d_pad, jnp.bfloat16)
    b1_p = pad2(b1, 1, d_pad, jnp.float32)
    b2_p = pad2(b2, 1, d_pad, jnp.float32)

    full2 = lambda shape: pl.BlockSpec(shape, lambda i: (0, 0))

    out_pad = pl.pallas_call(
        gcn_kernel,
        out_shape=jax.ShapeDtypeStruct((n_pad, d_pad), jnp.float32),
        grid=(1,),
        in_specs=[
            full2((n_pad, 1)),          # phoneme indices
            full2((e_pad, 1)),          # edge src (column)
            full2((e_pad, 1)),          # edge dst (column)
            full2((1, e_pad)),          # edge dst (row)
            full2((p_pad, d_pad)),      # embedding table
            full2((d_pad, d_pad)),      # W1
            full2((1, d_pad)),          # b1
            full2((d_pad, d_pad)),      # W2
            full2((1, d_pad)),          # b2
        ],
        out_specs=full2((n_pad, d_pad)),
        compiler_params=pltpu.CompilerParams(
            dimension_semantics=("arbitrary",)),
    )(idx, src, dst_c, dst_r, emb_p, w1_p, b1_p, w2_p, b2_p)

    return out_pad[:n, :d]


def xavier_uniform(key, shape):
    fan_in, fan_out = shape[0], shape[1]
    bound = jnp.sqrt(6.0 / (fan_in + fan_out))
    return jax.random.uniform(key, shape, jnp.float32, -bound, bound)


def init_params(key, num_phonemes, embed_dim, hidden_channels, out_channels):
    k_emb, k_w1, k_w2 = jax.random.split(key, 3)
    params = {
        # nn.init.xavier_uniform_ is applied to the full embedding table
        # (it overwrites the zeroed padding row), so we mirror that here.
        "embedding": xavier_uniform(k_emb, (num_phonemes, embed_dim)),
        # GCNConv linear weights (glorot init), biases zero.
        "w1": xavier_uniform(k_w1, (embed_dim, hidden_channels)),
        "b1": jnp.zeros((1, hidden_channels), jnp.float32),
        "w2": xavier_uniform(k_w2, (hidden_channels, out_channels)),
        "b2": jnp.zeros((1, out_channels), jnp.float32),
    }
    return params


if __name__ == "__main__":
    # Residual connections require embed_dim == hidden_channels == out_channels.
    NUM_PHONEMES = 40
    EMBED_DIM = 32
    HIDDEN = 32
    OUT = 32
    N_NODES = 16
    N_EDGES = 32

    key = jax.random.PRNGKey(0)
    k_params, k_idx, k_edge = jax.random.split(key, 3)

    params = init_params(k_params, NUM_PHONEMES, EMBED_DIM, HIDDEN, OUT)

    phoneme_indices = jax.random.randint(
        k_idx, (N_NODES,), 0, NUM_PHONEMES, dtype=jnp.int32)
    edge_index = jax.random.randint(
        k_edge, (2, N_EDGES), 0, N_NODES, dtype=jnp.int32)

    fwd = jax.jit(lookup_gcn_forward)
    out = fwd(phoneme_indices, edge_index, params)
    out = jax.block_until_ready(out)

    assert out.shape == (N_NODES, OUT)
    assert out.dtype == jnp.float32
    print("KERNEL_OK")
</pallas_src>

<mosaic_0001>
module attributes {stable_mosaic.version = 11 : i64} {
  func.func @gcn_kernel(%arg0: i32, %arg1: memref<128x1xi32, #tpu.memory_space<vmem>>, %arg2: memref<128x1xi32, #tpu.memory_space<vmem>>, %arg3: memref<128x1xi32, #tpu.memory_space<vmem>>, %arg4: memref<1x128xi32, #tpu.memory_space<vmem>>, %arg5: memref<128x128xbf16, #tpu.memory_space<vmem>>, %arg6: memref<128x128xbf16, #tpu.memory_space<vmem>>, %arg7: memref<1x128xf32, #tpu.memory_space<vmem>>, %arg8: memref<128x128xbf16, #tpu.memory_space<vmem>>, %arg9: memref<1x128xf32, #tpu.memory_space<vmem>>, %arg10: memref<128x128xf32, #tpu.memory_space<vmem>>) attributes {dimension_semantics = [#tpu.dimension_semantics<arbitrary>], iteration_bounds = array<i64: 1>, scalar_prefetch = 0 : i64, scratch_operands = 0 : i64, tpu.core_type = #tpu.core_type<tc>, window_params = [{pipeline_mode = #tpu.pipeline_mode<synchronous>, transform_indices = @transform_0, window_bounds = array<i64: 128, 1>}, {pipeline_mode = #tpu.pipeline_mode<synchronous>, transform_indices = @transform_1, window_bounds = array<i64: 128, 1>}, {pipeline_mode = #tpu.pipeline_mode<synchronous>, transform_indices = @transform_2, window_bounds = array<i64: 128, 1>}, {pipeline_mode = #tpu.pipeline_mode<synchronous>, transform_indices = @transform_3, window_bounds = array<i64: 1, 128>}, {pipeline_mode = #tpu.pipeline_mode<synchronous>, transform_indices = @transform_4, window_bounds = array<i64: 128, 128>}, {pipeline_mode = #tpu.pipeline_mode<synchronous>, transform_indices = @transform_5, window_bounds = array<i64: 128, 128>}, {pipeline_mode = #tpu.pipeline_mode<synchronous>, transform_indices = @transform_6, window_bounds = array<i64: 1, 128>}, {pipeline_mode = #tpu.pipeline_mode<synchronous>, transform_indices = @transform_7, window_bounds = array<i64: 128, 128>}, {pipeline_mode = #tpu.pipeline_mode<synchronous>, transform_indices = @transform_8, window_bounds = array<i64: 1, 128>}, {pipeline_mode = #tpu.pipeline_mode<synchronous>, transform_indices = @transform_9, window_bounds = array<i64: 128, 128>}]} {
    %0 = tpu.iota {dimensions = array<i32: 1>} : vector<128x128xi32>
    %c0 = arith.constant 0 : index
    %c0_0 = arith.constant 0 : index
    %1 = vector.load %arg1[%c0, %c0_0] : memref<128x1xi32, #tpu.memory_space<vmem>>, vector<128x1xi32>
    %2 = vector.broadcast %1 : vector<128x1xi32> to vector<128x128xi32>
    %3 = arith.cmpi eq, %2, %0 : vector<128x128xi32>
    %cst = arith.constant 1.000000e+00 : f32
    %cst_1 = arith.constant 0.000000e+00 : f32
    %4 = vector.broadcast %cst : f32 to vector<128x128xf32>
    %5 = vector.broadcast %cst_1 : f32 to vector<128x128xf32>
    %6 = arith.select %3, %4, %5 : vector<128x128xi1>, vector<128x128xf32>
    %7 = arith.truncf %6 : vector<128x128xf32> to vector<128x128xbf16>
    %c0_2 = arith.constant 0 : index
    %c0_3 = arith.constant 0 : index
    %8 = vector.load %arg5[%c0_2, %c0_3] : memref<128x128xbf16, #tpu.memory_space<vmem>>, vector<128x128xbf16>
    %cst_4 = arith.constant dense<0.000000e+00> : vector<128x128xf32>
    %9 = tpu.matmul %7, %8, %cst_4 {dimension_numbers = #tpu.dot_dimension_numbers<[1], [0], [0], [1], [0, 0, 1, 1], [], []>} : vector<128x128xbf16>, vector<128x128xbf16>, vector<128x128xf32> -> vector<128x128xf32>
    %10 = tpu.iota {dimensions = array<i32: 1>} : vector<128x128xi32>
    %11 = tpu.iota {dimensions = array<i32: 0>} : vector<128x128xi32>
    %c0_5 = arith.constant 0 : index
    %c0_6 = arith.constant 0 : index
    %12 = vector.load %arg2[%c0_5, %c0_6] : memref<128x1xi32, #tpu.memory_space<vmem>>, vector<128x1xi32>
    %13 = vector.broadcast %12 : vector<128x1xi32> to vector<128x128xi32>
    %14 = arith.cmpi eq, %13, %10 : vector<128x128xi32>
    %cst_7 = arith.constant 1.000000e+00 : f32
    %cst_8 = arith.constant 0.000000e+00 : f32
    %15 = vector.broadcast %cst_7 : f32 to vector<128x128xf32>
    %16 = vector.broadcast %cst_8 : f32 to vector<128x128xf32>
    %17 = arith.select %14, %15, %16 : vector<128x128xi1>, vector<128x128xf32>
    %c0_9 = arith.constant 0 : index
    %c0_10 = arith.constant 0 : index
    %18 = vector.load %arg3[%c0_9, %c0_10] : memref<128x1xi32, #tpu.memory_space<vmem>>, vector<128x1xi32>
    %19 = vector.broadcast %18 : vector<128x1xi32> to vector<128x128xi32>
    %20 = arith.cmpi eq, %19, %10 : vector<128x128xi32>
    %cst_11 = arith.constant 1.000000e+00 : f32
    %cst_12 = arith.constant 0.000000e+00 : f32
    %21 = vector.broadcast %cst_11 : f32 to vector<128x128xf32>
    %22 = vector.broadcast %cst_12 : f32 to vector<128x128xf32>
    %23 = arith.select %20, %21, %22 : vector<128x128xi1>, vector<128x128xf32>
    %c0_13 = arith.constant 0 : index
    %c0_14 = arith.constant 0 : index
    %24 = vector.load %arg4[%c0_13, %c0_14] : memref<1x128xi32, #tpu.memory_space<vmem>>, vector<1x128xi32>
    %25 = vector.broadcast %24 : vector<1x128xi32> to vector<128x128xi32>
    %26 = arith.cmpi eq, %25, %11 : vector<128x128xi32>
    %cst_15 = arith.constant 1.000000e+00 : f32
    %cst_16 = arith.constant 0.000000e+00 : f32
    %27 = vector.broadcast %cst_15 : f32 to vector<128x128xf32>
    %28 = vector.broadcast %cst_16 : f32 to vector<128x128xf32>
    %29 = arith.select %26, %27, %28 : vector<128x128xi1>, vector<128x128xf32>
    %30 = arith.truncf %29 : vector<128x128xf32> to vector<128x128xbf16>
    %31 = arith.truncf %17 : vector<128x128xf32> to vector<128x128xbf16>
    %cst_17 = arith.constant dense<0.000000e+00> : vector<128x128xf32>
    %32 = tpu.matmul %30, %31, %cst_17 {dimension_numbers = #tpu.dot_dimension_numbers<[1], [0], [0], [1], [0, 0, 1, 1], [], []>} : vector<128x128xbf16>, vector<128x128xbf16>, vector<128x128xf32> -> vector<128x128xf32>
    %cst_18 = arith.constant dense<0.000000e+00> : vector<128xf32>
    %33 = vector.multi_reduction <add>, %29, %cst_18 [1] : vector<128x128xf32> to vector<128xf32>
    %34 = vector.shape_cast %33 : vector<128xf32> to vector<128x1xf32>
    %cst_19 = arith.constant dense<0.000000e+00> : vector<128xf32>
    %35 = vector.multi_reduction <add>, %23, %cst_19 [0] : vector<128x128xf32> to vector<128xf32>
    %36 = vector.shape_cast %35 : vector<128xf32> to vector<1x128xf32>
    %cst_20 = arith.constant 0.000000e+00 : f32
    %37 = vector.broadcast %cst_20 : f32 to vector<128x1xf32>
    %38 = arith.cmpf ogt, %34, %37 : vector<128x1xf32>
    %cst_21 = arith.constant 1.000000e+00 : f32
    %39 = vector.broadcast %cst_21 : f32 to vector<128x1xf32>
    %40 = arith.maximumf %34, %39 : vector<128x1xf32>
    %41 = math.rsqrt %40 : vector<128x1xf32>
    %cst_22 = arith.constant 0.000000e+00 : f32
    %42 = vector.broadcast %cst_22 : f32 to vector<128x1xf32>
    %43 = arith.select %38, %41, %42 : vector<128x1xi1>, vector<128x1xf32>
    %cst_23 = arith.constant 0.000000e+00 : f32
    %44 = vector.broadcast %cst_23 : f32 to vector<1x128xf32>
    %45 = arith.cmpf ogt, %36, %44 : vector<1x128xf32>
    %cst_24 = arith.constant 1.000000e+00 : f32
    %46 = vector.broadcast %cst_24 : f32 to vector<1x128xf32>
    %47 = arith.maximumf %36, %46 : vector<1x128xf32>
    %48 = math.rsqrt %47 : vector<1x128xf32>
    %cst_25 = arith.constant 0.000000e+00 : f32
    %49 = vector.broadcast %cst_25 : f32 to vector<1x128xf32>
    %50 = arith.select %45, %48, %49 : vector<1x128xi1>, vector<1x128xf32>
    %51 = vector.broadcast %43 : vector<128x1xf32> to vector<128x128xf32>
    %52 = arith.mulf %32, %51 : vector<128x128xf32>
    %53 = vector.broadcast %50 : vector<1x128xf32> to vector<128x128xf32>
    %54 = arith.mulf %52, %53 : vector<128x128xf32>
    %55 = arith.truncf %54 : vector<128x128xf32> to vector<128x128xbf16>
    %56 = arith.truncf %9 : vector<128x128xf32> to vector<128x128xbf16>
    %c0_26 = arith.constant 0 : index
    %c0_27 = arith.constant 0 : index
    %57 = vector.load %arg6[%c0_26, %c0_27] : memref<128x128xbf16, #tpu.memory_space<vmem>>, vector<128x128xbf16>
    %cst_28 = arith.constant dense<0.000000e+00> : vector<128x128xf32>
    %58 = tpu.matmul %56, %57, %cst_28 {dimension_numbers = #tpu.dot_dimension_numbers<[1], [0], [0], [1], [0, 0, 1, 1], [], []>} : vector<128x128xbf16>, vector<128x128xbf16>, vector<128x128xf32> -> vector<128x128xf32>
    %59 = arith.truncf %58 : vector<128x128xf32> to vector<128x128xbf16>
    %cst_29 = arith.constant dense<0.000000e+00> : vector<128x128xf32>
    %60 = tpu.matmul %55, %59, %cst_29 {dimension_numbers = #tpu.dot_dimension_numbers<[1], [0], [0], [1], [0, 0, 1, 1], [], []>} : vector<128x128xbf16>, vector<128x128xbf16>, vector<128x128xf32> -> vector<128x128xf32>
    %c0_30 = arith.constant 0 : index
    %c0_31 = arith.constant 0 : index
    %61 = vector.load %arg7[%c0_30, %c0_31] : memref<1x128xf32, #tpu.memory_space<vmem>>, vector<1x128xf32>
    %62 = vector.broadcast %61 : vector<1x128xf32> to vector<128x128xf32>
    %63 = arith.addf %60, %62 : vector<128x128xf32>
    %64 = arith.addf %9, %63 : vector<128x128xf32>
    %65 = arith.truncf %64 : vector<128x128xf32> to vector<128x128xbf16>
    %c0_32 = arith.constant 0 : index
    %c0_33 = arith.constant 0 : index
    %66 = vector.load %arg8[%c0_32, %c0_33] : memref<128x128xbf16, #tpu.memory_space<vmem>>, vector<128x128xbf16>
    %cst_34 = arith.constant dense<0.000000e+00> : vector<128x128xf32>
    %67 = tpu.matmul %65, %66, %cst_34 {dimension_numbers = #tpu.dot_dimension_numbers<[1], [0], [0], [1], [0, 0, 1, 1], [], []>} : vector<128x128xbf16>, vector<128x128xbf16>, vector<128x128xf32> -> vector<128x128xf32>
    %68 = arith.truncf %67 : vector<128x128xf32> to vector<128x128xbf16>
    %cst_35 = arith.constant dense<0.000000e+00> : vector<128x128xf32>
    %69 = tpu.matmul %55, %68, %cst_35 {dimension_numbers = #tpu.dot_dimension_numbers<[1], [0], [0], [1], [0, 0, 1, 1], [], []>} : vector<128x128xbf16>, vector<128x128xbf16>, vector<128x128xf32> -> vector<128x128xf32>
    %c0_36 = arith.constant 0 : index
    %c0_37 = arith.constant 0 : index
    %70 = vector.load %arg9[%c0_36, %c0_37] : memref<1x128xf32, #tpu.memory_space<vmem>>, vector<1x128xf32>
    %71 = vector.broadcast %70 : vector<1x128xf32> to vector<128x128xf32>
    %72 = arith.addf %69, %71 : vector<128x128xf32>
    %73 = arith.addf %64, %72 : vector<128x128xf32>
    %c0_38 = arith.constant 0 : index
    %c0_39 = arith.constant 0 : index
    %74 = vector.load %arg10[%c0_38, %c0_39] : memref<128x128xf32, #tpu.memory_space<vmem>>, vector<128x128xf32>
    tpu.vector_store %arg10[%c0_38, %c0_39], %73 {strides = array<i32>} : memref<128x128xf32, #tpu.memory_space<vmem>>, vector<128x128xf32>,
    return
  }
  func.func @transform_0(%arg0: i32) -> (i32, i32) {
    %c0_i32 = arith.constant 0 : i32
    %c0_i32_0 = arith.constant 0 : i32
    %c0_i32_1 = arith.constant 0 : i32
    return %c0_i32, %c0_i32_0 : i32, i32
  }
  func.func @transform_1(%arg0: i32) -> (i32, i32) {
    %c0_i32 = arith.constant 0 : i32
    %c0_i32_0 = arith.constant 0 : i32
    %c0_i32_1 = arith.constant 0 : i32
    return %c0_i32, %c0_i32_0 : i32, i32
  }
  func.func @transform_2(%arg0: i32) -> (i32, i32) {
    %c0_i32 = arith.constant 0 : i32
    %c0_i32_0 = arith.constant 0 : i32
    %c0_i32_1 = arith.constant 0 : i32
    return %c0_i32, %c0_i32_0 : i32, i32
  }
  func.func @transform_3(%arg0: i32) -> (i32, i32) {
    %c0_i32 = arith.constant 0 : i32
    %c0_i32_0 = arith.constant 0 : i32
    %c0_i32_1 = arith.constant 0 : i32
    return %c0_i32, %c0_i32_0 : i32, i32
  }
  func.func @transform_4(%arg0: i32) -> (i32, i32) {
    %c0_i32 = arith.constant 0 : i32
    %c0_i32_0 = arith.constant 0 : i32
    %c0_i32_1 = arith.constant 0 : i32
    return %c0_i32, %c0_i32_0 : i32, i32
  }
  func.func @transform_5(%arg0: i32) -> (i32, i32) {
    %c0_i32 = arith.constant 0 : i32
    %c0_i32_0 = arith.constant 0 : i32
    %c0_i32_1 = arith.constant 0 : i32
    return %c0_i32, %c0_i32_0 : i32, i32
  }
  func.func @transform_6(%arg0: i32) -> (i32, i32) {
    %c0_i32 = arith.constant 0 : i32
    %c0_i32_0 = arith.constant 0 : i32
    %c0_i32_1 = arith.constant 0 : i32
    return %c0_i32, %c0_i32_0 : i32, i32
  }
  func.func @transform_7(%arg0: i32) -> (i32, i32) {
    %c0_i32 = arith.constant 0 : i32
    %c0_i32_0 = arith.constant 0 : i32
    %c0_i32_1 = arith.constant 0 : i32
    return %c0_i32, %c0_i32_0 : i32, i32
  }
  func.func @transform_8(%arg0: i32) -> (i32, i32) {
    %c0_i32 = arith.constant 0 : i32
    %c0_i32_0 = arith.constant 0 : i32
    %c0_i32_1 = arith.constant 0 : i32
    return %c0_i32, %c0_i32_0 : i32, i32
  }
  func.func @transform_9(%arg0: i32) -> (i32, i32) {
    %c0_i32 = arith.constant 0 : i32
    %c0_i32_0 = arith.constant 0 : i32
    %c0_i32_1 = arith.constant 0 : i32
    return %c0_i32, %c0_i32_0 : i32, i32
  }
}

</mosaic_0001>

<bundles_post_ra>
// kernel: lookup_gcn_forward.1
= control target key start
LH: loop header
LB: loop body
LE: loop exit
PB: predicated region body
PF: predicated region fallthrough
CT: control target
= control target key end

     0   :  { %v1860_v0 = vmov 0   ;;  %v33_v39 = vlaneseq  ;;  %v1861_v49 = vmov 1.0|1.0   ;;  %s2780_s0 = inlined_call_operand.vmem [shape: s32[128,1], index: 0, kind: input, shape index: {}]   ;;  %s2781_s4 = inlined_call_operand.vmem [shape: bf16[128,128], index: 4, kind: input, shape index: {}]   ;;  %s2782_s1 = inlined_call_operand.vmem [shape: s32[128,1], index: 1, kind: input, shape index: {}]   ;;  %s2783_s2 = inlined_call_operand.vmem [shape: s32[128,1], index: 2, kind: input, shape index: {}]   ;;  %s2784_s3 = inlined_call_operand.vmem [shape: s32[1,128], index: 3, kind: input, shape index: {}]   ;;  %s2785_s5 = inlined_call_operand.vmem [shape: bf16[128,128], index: 5, kind: input, shape index: {}]   ;;  %s2786_s7 = inlined_call_operand.vmem [shape: bf16[128,128], index: 7, kind: input, shape index: {}]   ;;  %s2787_s6 = inlined_call_operand.vmem [shape: f32[1,128], index: 6, kind: input, shape index: {}]   ;;  %s2788_s8 = inlined_call_operand.vmem [shape: f32[1,128], index: 8, kind: input, shape index: {}]   ;;  %s2789_s9 = inlined_call_operand.vmem [shape: f32[128,128], index: 9, kind: output, shape index: {}]  }
   0x1   :  { %1801 = vset.pattern.permute.xlu1 %v1860_v0  ;;  %1800 = vset.pattern.permute.xlu0 %v1860_v0  ;;  %v37_v1 = vld [vmem:[%s2780_s0 + $0x10] sm:$0xff]  ;;  %v35_v2 = vld [vmem:[%s2780_s0] sm:$0xff]  ;;  %v38_v3 = vld [vmem:[%s2780_s0 + $0x18] sm:$0xff] }
   0x2   :  { %58 = vperm.xlu1 %1801, %v37_v1   ;;  %52 = vperm.xlu0 %1800, %v35_v2   ;;  %v36_v4 = vld [vmem:[%s2780_s0 + $0x8] sm:$0xff]  ;;  %v39_v6 = vld [vmem:[%s2780_s0 + $0x20] sm:$0xff]  ;;  %v42_v7 = vld [vmem:[%s2780_s0 + $0x38] sm:$0xff]  ;;  %v2028_v40 = vshrl.u32 %v33_v39, 7 }
   0x3   :  { %v40_v5 = vld [vmem:[%s2780_s0 + $0x28] sm:$0xff]  ;;  %v41_v8 = vld [vmem:[%s2780_s0 + $0x30] sm:$0xff]  ;;  %v43_v10 = vld [vmem:[%s2780_s0 + $0x40] sm:$0xff] }
   0x4   :  { %v44_v9 = vld [vmem:[%s2780_s0 + $0x48] sm:$0xff]  ;;  %v46_v11 = vld [vmem:[%s2780_s0 + $0x58] sm:$0xff]  ;;  %v1803_v13 = vld [vmem:[%s2781_s4 + $0x30] sm:$0xff]   ;;  %v2037_v43 = vadd.s32 8, %v2028_v40  ;;  %v2045_v45 = vadd.s32 16, %v2028_v40  ;;  %v2048_v46 = vadd.s32 24, %v2028_v40 }
   0x5   :  { %v1802_v12 = vld [vmem:[%s2781_s4 + $0x38] sm:$0xff]   ;;  %v45_v14 = vld [vmem:[%s2780_s0 + $0x50] sm:$0xff]  ;;  %v1804_v15 = vld [vmem:[%s2781_s4 + $0x28] sm:$0xff]   ;;  %v2088_v53 = vadd.s32 32, %v2028_v40  ;;  %v2091_v54 = vadd.s32 40, %v2028_v40  ;;  %v2094_v55 = vadd.s32 48, %v2028_v40 }
   0x6   :  { %61 = vperm.xlu1 %1801, %v38_v3   ;;  %55 = vperm.xlu0 %1800, %v36_v4   ;;  %v48_v16 = vld [vmem:[%s2780_s0 + $0x68] sm:$0xff]  ;;  %v47_v17 = vld [vmem:[%s2780_s0 + $0x60] sm:$0xff]  ;;  %v50_v19 = vld [vmem:[%s2780_s0 + $0x78] sm:$0xff]  ;;  %v2097_v56 = vadd.s32 56, %v2028_v40  ;;  %v2140_v63 = vadd.s32 64, %v2028_v40  ;;  %v2143_v0 = vadd.s32 72, %v2028_v40 }
   0x7   :  { %1605 = vmatprep.subr.bf16.mxu0 %v1802_v12  ;;  %v1805_v18 = vld [vmem:[%s2781_s4 + $0x20] sm:$0xff]   ;;  %v49_v20 = vld [vmem:[%s2780_s0 + $0x70] sm:$0xff]  ;;  %v1806_v21 = vld [vmem:[%s2781_s4 + $0x18] sm:$0xff]   ;;  %v2146_v1 = vadd.s32 80, %v2028_v40  ;;  %v2149_v2 = vadd.s32 88, %v2028_v40 }
   0x8   :  { %1606 = vmatpush3.bf16.msra.mxu0 %v1802_v12  ;;  %v332_v22 = vld [vmem:[%s2782_s1 + $0x78] sm:$0xff]  ;;  %v331_v23 = vld [vmem:[%s2782_s1 + $0x70] sm:$0xff]  ;;  %v330_v25 = vld [vmem:[%s2782_s1 + $0x68] sm:$0xff]  ;;  %v2201_v12 = vadd.s32 120, %v2028_v40 }
   0x9   :  { %1607 = vmatprep.subr.bf16.mxu0 %v1803_v13  ;;  %v1807_v24 = vld [vmem:[%s2781_s4 + $0x10] sm:$0xff]   ;;  %v329_v26 = vld [vmem:[%s2782_s1 + $0x60] sm:$0xff]  ;;  %v1808_v27 = vld [vmem:[%s2781_s4 + $0x8] sm:$0xff]  }
   0xa   :  { %67 = vperm.xlu1 %1801, %v40_v5   ;;  %64 = vperm.xlu0 %1800, %v39_v6   ;;  %v328_v28 = vld [vmem:[%s2782_s1 + $0x58] sm:$0xff]  ;;  %v327_v29 = vld [vmem:[%s2782_s1 + $0x50] sm:$0xff]  ;;  %v1809_v30 = vld [vmem:[%s2781_s4] sm:$0xff]  }
   0xb   :  { %v326_v31 = vld [vmem:[%s2782_s1 + $0x48] sm:$0xff]  ;;  %v325_v32 = vld [vmem:[%s2782_s1 + $0x40] sm:$0xff]  ;;  %v324_v33 = vld [vmem:[%s2782_s1 + $0x38] sm:$0xff] }
   0xc   :  { %1608 = vmatpush3.bf16.msra.mxu0 %v1803_v13  ;;  %v323_v34 = vld [vmem:[%s2782_s1 + $0x30] sm:$0xff]  ;;  %v322_v35 = vld [vmem:[%s2782_s1 + $0x28] sm:$0xff]  ;;  %v321_v36 = vld [vmem:[%s2782_s1 + $0x20] sm:$0xff] }
   0xd   :  { %1609 = vmatprep.subr.bf16.mxu0 %v1804_v15  ;;  %v320_v37 = vld [vmem:[%s2782_s1 + $0x18] sm:$0xff]  ;;  %v319_v38 = vld [vmem:[%s2782_s1 + $0x10] sm:$0xff]  ;;  %v318_v41 = vld [vmem:[%s2782_s1 + $0x8] sm:$0xff] }
   0xe   :  { %73 = vperm.xlu1 %1801, %v42_v7   ;;  %70 = vperm.xlu0 %1800, %v41_v8   ;;  %v317_v42 = vld [vmem:[%s2782_s1] sm:$0xff]  ;;  %v414_v47 = vld [vmem:[%s2783_s2 + $0x8] sm:$0xff]  ;;  %v416_v51 = vld [vmem:[%s2783_s2 + $0x18] sm:$0xff] }
   0xf   :  { %v2042_v44 = vld [vmem:[%s2784_s3] ss:$0 sm:$0xff]  ;;  %v415_v52 = vld [vmem:[%s2783_s2 + $0x10] sm:$0xff]  ;;  %v418_v57 = vld [vmem:[%s2783_s2 + $0x28] sm:$0xff] }
  0x10   :  { %1610 = vmatpush3.bf16.msra.mxu0 %v1804_v15  ;;  %vm514_vm0 = vcmp.eq.s32.totalorder %v2042_v44, %v2028_v40  ;;  %vm515_vm1 = vcmp.eq.s32.totalorder %v2042_v44, %v2037_v43  ;;  %v413_v48 = vld [vmem:[%s2783_s2] sm:$0xff]  ;;  %vm516_vm3 = vcmp.eq.s32.totalorder %v2042_v44, %v2045_v45  ;;  %vm517_vm4 = vcmp.eq.s32.totalorder %v2042_v44, %v2048_v46  ;;  %v420_v61 = vld [vmem:[%s2783_s2 + $0x38] sm:$0xff]  ;;  %v419_v62 = vld [vmem:[%s2783_s2 + $0x30] sm:$0xff] }
  0x11   :  { %1611 = vmatprep.subr.bf16.mxu0 %v1805_v18  ;;  %vm1475_vm2 = vmpackc.low %vm515_vm1, %vm514_vm0  ;;  %vm518_vm6 = vcmp.eq.s32.totalorder %v2042_v44, %v2088_v53  ;;  %vm2796_vm7 = vcmp.eq.s32.totalorder %v2042_v44, %v2091_v54  ;;  %v417_v58 = vld [vmem:[%s2783_s2 + $0x20] sm:$0xff]  ;;  %vm2795_vm9 = vcmp.eq.s32.totalorder %v2042_v44, %v2094_v55  ;;  %vm2790_vm10 = vcmp.eq.s32.totalorder %v2042_v44, %v2097_v56  ;;  %v422_v3 = vld [vmem:[%s2783_s2 + $0x48] sm:$0xff] }
  0x12   :  { %79 = vperm.xlu1 %1801, %v44_v9   ;;  %76 = vperm.xlu0 %1800, %v43_v10   ;;  %vm2077_vm5 = vmpackc.low %vm517_vm4, %vm516_vm3  ;;  %vm2794_vm12 = vcmp.eq.s32.totalorder %v2042_v44, %v2140_v63  ;;  %vm2793_vm13 = vcmp.eq.s32.totalorder %v2042_v44, %v2143_v0  ;;  %v421_v4 = vld [vmem:[%s2783_s2 + $0x40] sm:$0xff]  ;;  %vm2792_vm15 = vcmp.eq.s32.totalorder %v2042_v44, %v2146_v1  ;;  %v424_v7 = vld [vmem:[%s2783_s2 + $0x58] sm:$0xff]  ;;  %v2192_v9 = vadd.s32 96, %v2028_v40 }
  0x13   :  { %1653 = vmatprep.mubr.msk.bf16.mxu1 %vm1475_vm2, %v1861_v49  ;;  %vm2115_vm8 = vmpackc.low %vm2796_vm7, %vm518_vm6  ;;  %vm2791_vm2 = vcmp.eq.s32.totalorder %v2042_v44, %v2149_v2  ;;  %v423_v8 = vld [vmem:[%s2783_s2 + $0x50] sm:$0xff]  ;;  %v2195_v10 = vadd.s32 104, %v2028_v40  ;;  %v426_v13 = vld [vmem:[%s2783_s2 + $0x68] sm:$0xff] }
  0x14   :  { %1612 = vmatpush3.bf16.msra.mxu0 %v1805_v18  ;;  %vm2129_vm11 = vmpackc.low %vm2790_vm10, %vm2795_vm9  ;;  %vm2797_vm9 = vcmp.eq.s32.totalorder %v2042_v44, %v2201_v12  ;;  %v427_v18 = vld [vmem:[%s2783_s2 + $0x70] sm:$0xff]  ;;  %v1817_v50 = vld [vmem:[%s2785_s5] sm:$0xff]  }
  0x15   :  { %1613 = vmatprep.subr.bf16.mxu0 %v1806_v21  ;;  %vm2167_vm14 = vmpackc.low %vm2793_vm13, %vm2794_vm12 }
  0x16   :  { %85 = vperm.xlu1 %1801, %v46_v11   ;;  %82 = vperm.xlu0 %1800, %v45_v14   ;;  %vm2181_vm10 = vmpackc.low %vm2791_vm2, %vm2792_vm15  ;;  %v2198_v11 = vadd.s32 112, %v2028_v40  ;;  %vm2800_vm2 = vcmp.eq.s32.totalorder %v2042_v44, %v2192_v9  ;;  %vm2799_vm15 = vcmp.eq.s32.totalorder %v2042_v44, %v2195_v10  ;;  %v425_v14 = vld [vmem:[%s2783_s2 + $0x60] sm:$0xff] }
  0x17   :  { %vm2219_vm13 = vmpackc.low %vm2799_vm15, %vm2800_vm2 }
  0x18   :  { %1614 = vmatpush3.bf16.msra.mxu0 %v1806_v21  ;;  %vm2798_vm12 = vcmp.eq.s32.totalorder %v2042_v44, %v2198_v11 }
  0x19   :  { %1615 = vmatprep.subr.bf16.mxu0 %v1807_v24  ;;  %vm2233_vm7 = vmpackc.low %vm2797_vm9, %vm2798_vm12 }
  0x1a   :  { %91 = vperm.xlu1 %1801, %v48_v16   ;;  %88 = vperm.xlu0 %1800, %v47_v17   ;;  %v428_v17 = vld [vmem:[%s2783_s2 + $0x78] sm:$0xff] }
  0x1c   :  { %1616 = vmatpush3.bf16.msra.mxu0 %v1807_v24  ;;  %v2251_v24 = vand.u32 127, %v33_v39 }
  0x1d   :  { %1617 = vmatprep.subr.bf16.mxu0 %v1808_v27 }
  0x1e   :  { %97 = vperm.xlu1 %1801, %v50_v19   ;;  %94 = vperm.xlu0 %1800, %v49_v20   ;;  %v1862_v19 = vmov 0.0  }
  0x1f   :  { %v530_v20 = vsel %vm514_vm0, 1.0, %v1862_v19 }
  0x20   :  { %1618 = vmatpush3.bf16.msra.mxu0 %v1808_v27 }
  0x21   :  { %1619 = vmatprep.subr.bf16.mxu0 %v1809_v30 }
  0x22   :  { %379 = vperm.xlu1 %1801, %v332_v22   ;;  %376 = vperm.xlu0 %1800, %v331_v23   ;;  %v1810_v23 = vld [vmem:[%s2785_s5 + $0x38] sm:$0xff]  }
  0x24   :  { %1620 = vmatpush3.bf16.msra.mxu0 %v1809_v30  ;;  %v1811_v30 = vld [vmem:[%s2785_s5 + $0x30] sm:$0xff]  }
  0x25   :  { %1669 = vmatprep.subr.bf16.mxu0 %v1810_v23 }
  0x26   :  { %373 = vperm.xlu1 %1801, %v330_v25   ;;  %370 = vperm.xlu0 %1800, %v329_v26   ;;  %v532_v25 = vsel %vm516_vm3, 1.0, %v1862_v19  ;;  %v531_v26 = vsel %vm515_vm1, 1.0, %v1862_v19 }
  0x2a   :  { %367 = vperm.xlu1 %1801, %v328_v28   ;;  %364 = vperm.xlu0 %1800, %v327_v29   ;;  %v533_v29 = vsel %vm517_vm4, 1.0, %v1862_v19 }
  0x2e   :  { %361 = vperm.xlu1 %1801, %v326_v31   ;;  %358 = vperm.xlu0 %1800, %v325_v32   ;;  %v534_v31 = vsel %vm518_vm6, 1.0, %v1862_v19  ;;  %vm2816_vm6 = vcmp.eq.s32.totalorder %v2042_v44, %v2094_v55 }
  0x32   :  { %355 = vperm.xlu1 %1801, %v324_v33   ;;  %352 = vperm.xlu0 %1800, %v323_v34  }
  0x36   :  { %349 = vperm.xlu1 %1801, %v322_v35   ;;  %346 = vperm.xlu0 %1800, %v321_v36   ;;  %v536_v35 = vsel %vm2816_vm6, 1.0, %v1862_v19  ;;  %v1812_v36 = vld [vmem:[%s2785_s5 + $0x28] sm:$0xff]  }
  0x3a   :  { %343 = vperm.xlu1 %1801, %v320_v37   ;;  %340 = vperm.xlu0 %1800, %v319_v38  }
  0x3e   :  { %337 = vperm.xlu1 %1801, %v318_v41   ;;  %334 = vperm.xlu0 %1800, %v317_v42   ;;  %v1813_v41 = vld [vmem:[%s2785_s5 + $0x20] sm:$0xff]  }
  0x42   :  { %433 = vperm.xlu1 %1801, %v414_v47   ;;  %430 = vperm.xlu0 %1800, %v413_v48   ;;  %v1814_v47 = vld [vmem:[%s2785_s5 + $0x18] sm:$0xff]  }
  0x46   :  { %439 = vperm.xlu1 %1801, %v416_v51   ;;  %436 = vperm.xlu0 %1800, %v415_v52  }
  0x4a   :  { %445 = vperm.xlu1 %1801, %v418_v57   ;;  %442 = vperm.xlu0 %1800, %v417_v58  }
  0x4e   :  { %451 = vperm.xlu1 %1801, %v420_v61   ;;  %448 = vperm.xlu0 %1800, %v419_v62  }
  0x52   :  { %457 = vperm.xlu1 %1801, %v422_v3   ;;  %454 = vperm.xlu0 %1800, %v421_v4  }
  0x56   :  { %463 = vperm.xlu1 %1801, %v424_v7   ;;  %460 = vperm.xlu0 %1800, %v423_v8  }
  0x5a   :  { %469 = vperm.xlu1 %1801, %v426_v13   ;;  %466 = vperm.xlu0 %1800, %v425_v14  }
  0x5e   :  { %475 = vperm.xlu1 %1801, %v428_v17   ;;  %472 = vperm.xlu0 %1800, %v427_v18  }
  0x7d   :  { %v59_v21 = vpop.permute.xlu1 %58  ;;  %v53_v22 = vpop.permute.xlu0 %52  ;;  %659 = vadd.xlane.f32.xlu0 %v530_v20  ;;  %v1816_v20 = vld [vmem:[%s2785_s5 + $0x8] sm:$0xff]  }
  0x7e   :  { %vm101_vm0 = vcmp.eq.s32.totalorder %v59_v21, %v2251_v24  ;;  %vm99_vm1 = vcmp.eq.s32.totalorder %v53_v22, %v2251_v24 }
  0x81   :  { %v62_v27 = vpop.permute.xlu1 %61  ;;  %v56_v28 = vpop.permute.xlu0 %55  ;;  %663 = vadd.xlane.f32.xlu0 %v532_v25 }
  0x82   :  { %vm102_vm9 = vcmp.eq.s32.totalorder %v62_v27, %v2251_v24  ;;  %vm100_vm12 = vcmp.eq.s32.totalorder %v56_v28, %v2251_v24  ;;  %661 = vadd.xlane.f32.xlu1 %v531_v26 }
  0x83   :  { %vm1444_vm3 = vmpackc.low %vm102_vm9, %vm101_vm0  ;;  %vm2815_vm9 = vcmp.eq.s32.totalorder %v2042_v44, %v2091_v54  ;;  %v1815_v54 = vld [vmem:[%s2785_s5 + $0x10] sm:$0xff]  }
  0x84   :  { %vm1442_vm15 = vmpackc.low %vm100_vm12, %vm99_vm1  ;;  %v535_v34 = vsel %vm2815_vm9, 1.0, %v1862_v19 }
  0x85   :  { %1621 = vmatprep.mubr.msk.bf16.mxu0 %vm1442_vm15, %v1861_v49  ;;  %v68_v32 = vpop.permute.xlu1 %67  ;;  %v65_v33 = vpop.permute.xlu0 %64  ;;  %665 = vadd.xlane.f32.xlu0 %v533_v29 }
  0x86   :  { %vm104_vm4 = vcmp.eq.s32.totalorder %v68_v32, %v2251_v24  ;;  %1622 = vmatmul.mubr.msk.bf16.vlgmr.msra.gmra.mxu0 %vm1444_vm3, %v1861_v49  ;;  %vm103_vm2 = vcmp.eq.s32.totalorder %v65_v33, %v2251_v24  ;;  %667 = vadd.xlane.f32.xlu1 %v534_v31  ;;  %vm2818_vm3 = vcmp.eq.s32.totalorder %v2042_v44, %v2140_v63 }
  0x87   :  { %vm1446_vm0 = vmpackc.low %vm104_vm4, %vm103_vm2  ;;  %1670 = vmatpush3.bf16.msra.mxu0 %v1810_v23  ;;  %vm2817_vm2 = vcmp.eq.s32.totalorder %v2042_v44, %v2097_v56  ;;  %v538_v40 = vsel %vm2818_vm3, 1.0, %v1862_v19 }
  0x88   :  { %1625 = vmatprep.mubr.msk.bf16.mxu0 %vm1446_vm0, %v1861_v49  ;;  %1671 = vmatprep.subr.bf16.mxu0 %v1811_v30  ;;  %v537_v39 = vsel %vm2817_vm2, 1.0, %v1862_v19  ;;  %vm2819_vm0 = vcmp.eq.s32.totalorder %v2042_v44, %v2143_v0 }
  0x89   :  { %v74_v37 = vpop.permute.xlu1 %73  ;;  %v71_v38 = vpop.permute.xlu0 %70  ;;  %669 = vadd.xlane.f32.xlu0 %v535_v34  ;;  %v539_v45 = vsel %vm2819_vm0, 1.0, %v1862_v19 }
  0x8a   :  { %vm106_vm12 = vcmp.eq.s32.totalorder %v74_v37, %v2251_v24  ;;  %vm105_vm15 = vcmp.eq.s32.totalorder %v71_v38, %v2251_v24  ;;  %671 = vadd.xlane.f32.xlu1 %v536_v35 }
  0x8b   :  { %vm1448_vm1 = vmpackc.low %vm106_vm12, %vm105_vm15  ;;  %1672 = vmatpush3.bf16.msra.mxu0 %v1811_v30  ;;  %vm2820_vm12 = vcmp.eq.s32.totalorder %v2042_v44, %v2146_v1 }
  0x8c   :  { %1673 = vmatprep.subr.bf16.mxu0 %v1812_v36  ;;  %v540_v46 = vsel %vm2820_vm12, 1.0, %v1862_v19 }
  0x8d   :  { %v80_v42 = vpop.permute.xlu1 %79  ;;  %v77_v43 = vpop.permute.xlu0 %76  ;;  %673 = vadd.xlane.f32.xlu0 %v537_v39 }
  0x8e   :  { %vm108_vm4 = vcmp.eq.s32.totalorder %v80_v42, %v2251_v24  ;;  %1626 = vmatmul.mubr.msk.bf16.gmra.mxu0 %vm1448_vm1, %v1861_v49  ;;  %vm107_vm9 = vcmp.eq.s32.totalorder %v77_v43, %v2251_v24  ;;  %675 = vadd.xlane.f32.xlu1 %v538_v40  ;;  %vm2821_vm1 = vcmp.eq.s32.totalorder %v2042_v44, %v2149_v2 }
  0x8f   :  { %vm1450_vm6 = vmpackc.low %vm108_vm4, %vm107_vm9  ;;  %1674 = vmatpush3.bf16.msra.mxu0 %v1812_v36  ;;  %v541_v52 = vsel %vm2821_vm1, 1.0, %v1862_v19  ;;  %vm2822_vm4 = vcmp.eq.s32.totalorder %v2042_v44, %v2192_v9 }
  0x90   :  { %1629 = vmatprep.mubr.msk.bf16.mxu0 %vm1450_vm6, %v1861_v49  ;;  %1675 = vmatprep.subr.bf16.mxu0 %v1813_v41  ;;  %v542_v53 = vsel %vm2822_vm4, 1.0, %v1862_v19  ;;  %vm2823_vm6 = vcmp.eq.s32.totalorder %v2042_v44, %v2195_v10 }
  0x91   :  { %v86_v48 = vpop.permute.xlu1 %85  ;;  %v83_v51 = vpop.permute.xlu0 %82  ;;  %677 = vadd.xlane.f32.xlu0 %v539_v45  ;;  %v543_v57 = vsel %vm2823_vm6, 1.0, %v1862_v19 }
  0x92   :  { %vm110_vm15 = vcmp.eq.s32.totalorder %v86_v48, %v2251_v24  ;;  %vm109_vm2 = vcmp.eq.s32.totalorder %v83_v51, %v2251_v24  ;;  %679 = vadd.xlane.f32.xlu1 %v540_v46 }
  0x93   :  { %vm1452_vm3 = vmpackc.low %vm110_vm15, %vm109_vm2  ;;  %1676 = vmatpush3.bf16.msra.mxu0 %v1813_v41  ;;  %vm2824_vm15 = vcmp.eq.s32.totalorder %v2042_v44, %v2198_v11 }
  0x94   :  { %1677 = vmatprep.subr.bf16.mxu0 %v1814_v47  ;;  %v544_v58 = vsel %vm2824_vm15, 1.0, %v1862_v19 }
  0x95   :  { %v92_v55 = vpop.permute.xlu1 %91  ;;  %v89_v56 = vpop.permute.xlu0 %88  ;;  %681 = vadd.xlane.f32.xlu0 %v541_v52 }
  0x96   :  { %vm112_vm9 = vcmp.eq.s32.totalorder %v92_v55, %v2251_v24  ;;  %1630 = vmatmul.mubr.msk.bf16.gmra.mxu0 %vm1452_vm3, %v1861_v49  ;;  %vm111_vm0 = vcmp.eq.s32.totalorder %v89_v56, %v2251_v24  ;;  %683 = vadd.xlane.f32.xlu1 %v542_v53  ;;  %vm2825_vm3 = vcmp.eq.s32.totalorder %v2042_v44, %v2201_v12 }
  0x97   :  { %vm1454_vm12 = vmpackc.low %vm112_vm9, %vm111_vm0  ;;  %1678 = vmatpush3.bf16.msra.mxu0 %v1814_v47  ;;  %v545_v63 = vsel %vm2825_vm3, 1.0, %v1862_v19 }
  0x98   :  { %1633 = vmatprep.mubr.msk.bf16.mxu0 %vm1454_vm12, %v1861_v49  ;;  %1679 = vmatprep.subr.bf16.mxu0 %v1815_v54 }
  0x99   :  { %v98_v61 = vpop.permute.xlu1 %97  ;;  %v95_v62 = vpop.permute.xlu0 %94  ;;  %685 = vadd.xlane.f32.xlu0 %v543_v57 }
  0x9a   :  { %vm114_vm2 = vcmp.eq.s32.totalorder %v98_v61, %v2251_v24  ;;  %vm113_vm1 = vcmp.eq.s32.totalorder %v95_v62, %v2251_v24  ;;  %687 = vadd.xlane.f32.xlu1 %v544_v58 }
  0x9b   :  { %vm1456_vm4 = vmpackc.low %vm114_vm2, %vm113_vm1  ;;  %1680 = vmatpush3.bf16.msra.mxu0 %v1815_v54 }
  0x9c   :  { %1681 = vmatprep.subr.bf16.mxu0 %v1816_v20 }
  0x9d   :  { %v380_v0 = vpop.permute.xlu1 %379  ;;  %v377_v1 = vpop.permute.xlu0 %376  ;;  %689 = vadd.xlane.f32.xlu0 %v545_v63 }
  0x9e   :  { %vm396_vm9 = vcmp.eq.s32.totalorder %v380_v0, %v2251_v24  ;;  %1634 = vmatmul.mubr.msk.bf16.gmra.mxu0 %vm1456_vm4, %v1861_v49  ;;  %vm395_vm0 = vcmp.eq.s32.totalorder %v377_v1, %v2251_v24 }
  0x9f   :  { %vm1459_vm6 = vmpackc.low %vm396_vm9, %vm395_vm0  ;;  %1682 = vmatpush3.bf16.msra.mxu0 %v1816_v20 }
  0xa0   :  { %1637 = vmatprep.subr.msk.bf16.mxu1 %vm1459_vm6, %v1861_v49  ;;  %1683 = vmatprep.subr.bf16.mxu0 %v1817_v50 }
  0xa1   :  { %v374_v2 = vpop.permute.xlu1 %373  ;;  %1638 = vmatpush3.bf16.msk.msra.mxu1 %vm1459_vm6, %v1861_v49  ;;  %v371_v3 = vpop.permute.xlu0 %370 }
  0xa2   :  { %vm394_vm12 = vcmp.eq.s32.totalorder %v374_v2, %v2251_v24  ;;  %vm393_vm15 = vcmp.eq.s32.totalorder %v371_v3, %v2251_v24 }
  0xa3   :  { %vm1461_vm2 = vmpackc.low %vm394_vm12, %vm393_vm15  ;;  %1684 = vmatpush3.bf16.msra.mxu0 %v1817_v50 }
  0xa4   :  { %1639 = vmatprep.subr.msk.bf16.mxu1 %vm1461_vm2, %v1861_v49 }
  0xa5   :  { %v368_v44 = vpop.permute.xlu1 %367  ;;  %1640 = vmatpush3.bf16.msk.msra.mxu1 %vm1461_vm2, %v1861_v49  ;;  %v365_v4 = vpop.permute.xlu0 %364 }
  0xa6   :  { %vm392_vm1 = vcmp.eq.s32.totalorder %v368_v44, %v2251_v24  ;;  %vm391_vm3 = vcmp.eq.s32.totalorder %v365_v4, %v2251_v24 }
  0xa7   :  { %vm1463_vm4 = vmpackc.low %vm392_vm1, %vm391_vm3 }
  0xa8   :  { %1641 = vmatprep.subr.msk.bf16.mxu1 %vm1463_vm4, %v1861_v49 }
  0xa9   :  { %v362_v7 = vpop.permute.xlu1 %361  ;;  %1642 = vmatpush3.bf16.msk.msra.mxu1 %vm1463_vm4, %v1861_v49  ;;  %v359_v8 = vpop.permute.xlu0 %358 }
  0xaa   :  { %vm390_vm9 = vcmp.eq.s32.totalorder %v362_v7, %v2251_v24  ;;  %vm389_vm0 = vcmp.eq.s32.totalorder %v359_v8, %v2251_v24 }
  0xab   :  { %vm1465_vm6 = vmpackc.low %vm390_vm9, %vm389_vm0 }
  0xac   :  { %1643 = vmatprep.subr.msk.bf16.mxu1 %vm1465_vm6, %v1861_v49 }
  0xad   :  { %v356_v9 = vpop.permute.xlu1 %355  ;;  %1644 = vmatpush3.bf16.msk.msra.mxu1 %vm1465_vm6, %v1861_v49  ;;  %v353_v10 = vpop.permute.xlu0 %352 }
  0xae   :  { %vm388_vm12 = vcmp.eq.s32.totalorder %v356_v9, %v2251_v24  ;;  %vm387_vm15 = vcmp.eq.s32.totalorder %v353_v10, %v2251_v24 }
  0xaf   :  { %vm1467_vm2 = vmpackc.low %vm388_vm12, %vm387_vm15 }
  0xb0   :  { %1645 = vmatprep.subr.msk.bf16.mxu1 %vm1467_vm2, %v1861_v49 }
  0xb1   :  { %v350_v11 = vpop.permute.xlu1 %349  ;;  %1646 = vmatpush3.bf16.msk.msra.mxu1 %vm1467_vm2, %v1861_v49  ;;  %v347_v12 = vpop.permute.xlu0 %346 }
  0xb2   :  { %vm386_vm1 = vcmp.eq.s32.totalorder %v350_v11, %v2251_v24  ;;  %vm385_vm3 = vcmp.eq.s32.totalorder %v347_v12, %v2251_v24 }
  0xb3   :  { %vm1469_vm4 = vmpackc.low %vm386_vm1, %vm385_vm3 }
  0xb4   :  { %1647 = vmatprep.subr.msk.bf16.mxu1 %vm1469_vm4, %v1861_v49 }
  0xb5   :  { %v344_v13 = vpop.permute.xlu1 %343  ;;  %1648 = vmatpush3.bf16.msk.msra.mxu1 %vm1469_vm4, %v1861_v49  ;;  %v341_v14 = vpop.permute.xlu0 %340 }
  0xb6   :  { %vm384_vm9 = vcmp.eq.s32.totalorder %v344_v13, %v2251_v24  ;;  %vm383_vm0 = vcmp.eq.s32.totalorder %v341_v14, %v2251_v24 }
  0xb7   :  { %vm1471_vm6 = vmpackc.low %vm384_vm9, %vm383_vm0 }
  0xb8   :  { %1649 = vmatprep.subr.msk.bf16.mxu1 %vm1471_vm6, %v1861_v49 }
  0xb9   :  { %v338_v17 = vpop.permute.xlu1 %337  ;;  %1650 = vmatpush3.bf16.msk.msra.mxu1 %vm1471_vm6, %v1861_v49  ;;  %v335_v18 = vpop.permute.xlu0 %334 }
  0xba   :  { %vm382_vm12 = vcmp.eq.s32.totalorder %v338_v17, %v2251_v24  ;;  %vm381_vm15 = vcmp.eq.s32.totalorder %v335_v18, %v2251_v24 }
  0xbb   :  { %vm1473_vm2 = vmpackc.low %vm382_vm12, %vm381_vm15 }
  0xbc   :  { %1651 = vmatprep.subr.msk.bf16.mxu1 %vm1473_vm2, %v1861_v49 }
  0xbd   :  { %1652 = vmatpush3.bf16.msk.msra.mxu1 %vm1473_vm2, %v1861_v49  ;;  %v431_v59 = vpop.permute.xlu0 %430  ;;  %v434_v60 = vpop.permute.xlu1 %433 }
  0xc0   :  { %1654 = vmatmul.mubr.msk.bf16.vlgmr.msra.gmra.mxu1 %vm2077_vm5, %v1861_v49  ;;  %vm478_vm5 = vcmp.eq.s32.totalorder %v434_v60, %v2251_v24 }
  0xc1   :  { %1657 = vmatprep.mubr.msk.bf16.mxu1 %vm2115_vm8, %v1861_v49  ;;  %v437_v5 = vpop.permute.xlu0 %436  ;;  %vm477_vm8 = vcmp.eq.s32.totalorder %v431_v59, %v2251_v24  ;;  %v494_v6 = vsel %vm478_vm5, 1.0, %v1862_v19  ;;  %v440_v22 = vpop.permute.xlu1 %439 }
  0xc2   :  { %v493_v21 = vsel %vm477_vm8, 1.0, %v1862_v19 }
  0xc3   :  { %v691_v23 = vadd.f32 %v494_v6, %v493_v21 }
  0xc5   :  { %v443_v25 = vpop.permute.xlu0 %442  ;;  %v446_v27 = vpop.permute.xlu1 %445 }
  0xc8   :  { %1658 = vmatmul.mubr.msk.bf16.gmra.mxu1 %vm2129_vm11, %v1861_v49  ;;  %vm479_vm11 = vcmp.eq.s32.totalorder %v437_v5, %v2251_v24 }
  0xc9   :  { %1661 = vmatprep.mubr.msk.bf16.mxu1 %vm2167_vm14, %v1861_v49  ;;  %v495_v15 = vsel %vm479_vm11, 1.0, %v1862_v19  ;;  %v449_v29 = vpop.permute.xlu0 %448  ;;  %v452_v33 = vpop.permute.xlu1 %451 }
  0xca   :  { %vm483_vm14 = vcmp.eq.s32.totalorder %v449_v29, %v2251_v24  ;;  %vm484_vm1 = vcmp.eq.s32.totalorder %v452_v33, %v2251_v24 }
  0xcb   :  { %v499_v34 = vsel %vm483_vm14, 1.0, %v1862_v19  ;;  %v500_v37 = vsel %vm484_vm1, 1.0, %v1862_v19 }
  0xcd   :  { %v455_v35 = vpop.permute.xlu0 %454  ;;  %v458_v39 = vpop.permute.xlu1 %457 }
  0xce   :  { %vm485_vm3 = vcmp.eq.s32.totalorder %v455_v35, %v2251_v24  ;;  %vm486_vm4 = vcmp.eq.s32.totalorder %v458_v39, %v2251_v24 }
  0xcf   :  { %v501_v40 = vsel %vm485_vm3, 1.0, %v1862_v19  ;;  %v502_v43 = vsel %vm486_vm4, 1.0, %v1862_v19 }
  0xd0   :  { %1662 = vmatmul.mubr.msk.bf16.gmra.mxu1 %vm2181_vm10, %v1861_v49  ;;  %vm481_vm10 = vcmp.eq.s32.totalorder %v443_v25, %v2251_v24 }
  0xd1   :  { %1665 = vmatprep.mubr.msk.bf16.mxu1 %vm2219_vm13, %v1861_v49  ;;  %v497_v28 = vsel %vm481_vm10, 1.0, %v1862_v19  ;;  %vm482_vm13 = vcmp.eq.s32.totalorder %v446_v27, %v2251_v24  ;;  %v461_v41 = vpop.permute.xlu0 %460  ;;  %v464_v46 = vpop.permute.xlu1 %463 }
  0xd2   :  { %v498_v31 = vsel %vm482_vm13, 1.0, %v1862_v19  ;;  %vm487_vm9 = vcmp.eq.s32.totalorder %v461_v41, %v2251_v24  ;;  %vm488_vm0 = vcmp.eq.s32.totalorder %v464_v46, %v2251_v24 }
  0xd3   :  { %v503_v47 = vsel %vm487_vm9, 1.0, %v1862_v19  ;;  %v504_v52 = vsel %vm488_vm0, 1.0, %v1862_v19 }
  0xd5   :  { %v467_v48 = vpop.permute.xlu0 %466  ;;  %v470_v54 = vpop.permute.xlu1 %469 }
  0xd6   :  { %vm489_vm6 = vcmp.eq.s32.totalorder %v467_v48, %v2251_v24  ;;  %vm490_vm12 = vcmp.eq.s32.totalorder %v470_v54, %v2251_v24 }
  0xd7   :  { %v505_v55 = vsel %vm489_vm6, 1.0, %v1862_v19  ;;  %v506_v61 = vsel %vm490_vm12, 1.0, %v1862_v19 }
  0xd8   :  { %1666 = vmatmul.mubr.msk.bf16.gmra.mxu1 %vm2233_vm7, %v1861_v49  ;;  %vm480_vm7 = vcmp.eq.s32.totalorder %v440_v22, %v2251_v24  ;;  %v692_v49 = vadd.f32 %v691_v23, %v495_v15 }
  0xd9   :  { %v496_v16 = vsel %vm480_vm7, 1.0, %v1862_v19  ;;  %v473_v56 = vpop.permute.xlu0 %472  ;;  %v476_v0 = vpop.permute.xlu1 %475 }
  0xda   :  { %v693_v26 = vadd.f32 %v692_v49, %v496_v16  ;;  %vm491_vm15 = vcmp.eq.s32.totalorder %v473_v56, %v2251_v24  ;;  %vm492_vm2 = vcmp.eq.s32.totalorder %v476_v0, %v2251_v24 }
  0xdb   :  { %v507_v1 = vsel %vm491_vm15, 1.0, %v1862_v19  ;;  %v508_v9 = vsel %vm492_vm2, 1.0, %v1862_v19 }
  0xdc   :  { %v694_v30 = vadd.f32 %v693_v26, %v497_v28 }
  0xde   :  { %v695_v32 = vadd.f32 %v694_v30, %v498_v31 }
  0xe0   :  { %v696_v36 = vadd.f32 %v695_v32, %v499_v34 }
  0xe2   :  { %v697_v38 = vadd.f32 %v696_v36, %v500_v37 }
  0xe4   :  { %v698_v42 = vadd.f32 %v697_v38, %v501_v40 }
  0xe6   :  { %v699_v45 = vadd.f32 %v698_v42, %v502_v43 }
  0xe8   :  { %v700_v51 = vadd.f32 %v699_v45, %v503_v47 }
  0xea   :  { %v701_v53 = vadd.f32 %v700_v51, %v504_v52 }
  0xec   :  { %v702_v57 = vadd.f32 %v701_v53, %v505_v55 }
  0xee   :  { %v703_v62 = vadd.f32 %v702_v57, %v506_v61 }
  0xf0   :  { %v704_v3 = vadd.f32 %v703_v62, %v507_v1 }
  0xf2   :  { %v705_v10 = vadd.f32 %v704_v3, %v508_v9  ;;  %v1819_v9 = vld [vmem:[%s2786_s7 + $0x30] sm:$0xff]  }
  0xf4   :  { %v706_v24 = vrot.slane %v705_v10, 4 }
  0xf6   :  { %v707_v19 = vadd.f32 %v706_v24, %v705_v10  ;;  %v1820_v10 = vld [vmem:[%s2786_s7 + $0x28] sm:$0xff]   ;;  %v1821_v24 = vld [vmem:[%s2786_s7 + $0x20] sm:$0xff]  }
  0xf8   :  { %v708_v59 = vrot.slane %v707_v19, 2 }
  0xfa   :  { %v709_v15 = vadd.f32 %v708_v59, %v707_v19 }
  0xfc   :  { %v710_v49 = vrot.slane %v709_v15, 1 }
  0xfe   :  { %v711_v29 = vadd.f32 %v710_v49, %v709_v15 }
 0x100   :  { %v777_v32 = vmax.f32 %v711_v29, 1.0  ;;  %vm776_vm7 = vcmp.gt.f32.partialorder %v711_v29, 0.0 }
 0x106   :  { %v660_v22 = vpop.xlane.xlu0 %659 }
 0x107   :  { %v728_v33 = vmax.f32 %v660_v22, 1.0  ;;  %vm712_vm8 = vcmp.gt.f32.partialorder %v660_v22, 0.0 }
 0x10a   :  { %v664_v27 = vpop.xlane.xlu0 %663 }
 0x10b   :  { %v730_v30 = vmax.f32 %v664_v27, 1.0  ;;  %v662_v35 = vpop.xlane.xlu1 %661  ;;  %vm714_vm5 = vcmp.gt.f32.partialorder %v664_v27, 0.0 }
 0x10c   :  { %v729_v36 = vmax.f32 %v662_v35, 1.0  ;;  %vm713_vm10 = vcmp.gt.f32.partialorder %v662_v35, 0.0 }
 0x10d   :  { %1826 = vrsqrt.f32 %v730_v30 }
 0x10e   :  { %v666_v31 = vpop.xlane.xlu0 %665  ;;  %1828 = vrsqrt.f32 %v777_v32 }
 0x10f   :  { %v731_v34 = vmax.f32 %v666_v31, 1.0  ;;  %1830 = vrsqrt.f32 %v728_v33  ;;  %vm715_vm11 = vcmp.gt.f32.partialorder %v666_v31, 0.0  ;;  %v2527_v31 = vpop.xlane.xlu1 %667 }
 0x110   :  { %vm716_vm14 = vcmp.gt.f32.partialorder %v2527_v31, 0.0 }
 0x111   :  { %1832 = vrsqrt.f32 %v731_v34 }
 0x112   :  { %1834 = vrsqrt.f32 %v729_v36  ;;  %v2525_v29 = vpop.xlane.xlu0 %669 }
 0x113   :  { %vm717_vm13 = vcmp.gt.f32.partialorder %v2525_v29, 0.0 }
 0x116   :  { %v2531_v35 = vpop.xlane.xlu0 %673 }
 0x117   :  { %vm719_vm1 = vcmp.gt.f32.partialorder %v2531_v35, 0.0 }
 0x11a   :  { %v1827_v37 = vpop.eup %1826 }
 0x11b   :  { %v1829_v38 = vpop.eup %1828  ;;  %v762_v40 = vsel %vm714_vm5, %v1827_v37, 0.0 }
 0x11c   :  { %v1831_v39 = vpop.eup %1830  ;;  %v2491_v46 = vsel %vm776_vm7, %v1829_v38, 0.0  ;;  %v2535_v38 = vpop.xlane.xlu1 %671 }
 0x11d   :  { %v760_v48 = vsel %vm712_vm8, %v1831_v39, 0.0  ;;  %vm718_vm4 = vcmp.gt.f32.partialorder %v2535_v38, 0.0 }
 0x11e   :  { %v1833_v41 = vpop.eup %1832 }
 0x11f   :  { %v1835_v43 = vpop.eup %1834  ;;  %v763_v51 = vsel %vm715_vm11, %v1833_v41, 0.0  ;;  %v733_v41 = vmax.f32 %v2525_v29, 1.0 }
 0x120   :  { %v761_v54 = vsel %vm713_vm10, %v1835_v43, 0.0 }
 0x121   :  { %1836 = vrsqrt.f32 %v733_v41 }
 0x146   :  { %v2439_v58 = vpop.f32.mrf.mxu0 }
 0x148   :  { %v2442_v63 = vpop.f32.mrf.mxu0 }
 0x14a   :  { %v2445_v2 = vpop.f32.mrf.mxu0 }
 0x14b   :  { %v821_v7 = vpack.c.bf16 %v2445_v2, %v2439_v58 }
 0x14c   :  { %v2448_v44 = vpop.f32.mrf.mxu0 }
 0x14d   :  { %v820_v4 = vpack.c.bf16 %v2448_v44, %v2442_v63 }
 0x14e   :  { %v2454_v8 = vpop.f32.mrf.mxu0 }
 0x14f   :  { %1685 = vmatprep.mubr.bf16.mxu0 %v820_v4 }
 0x150   :  { %v2457_v11 = vpop.f32.mrf.mxu0  ;;  %1686 = vmatmul.mubr.bf16.vlgmr.msra.gmra.mxu0 %v821_v7  ;;  %v1818_v7 = vld [vmem:[%s2786_s7 + $0x38] sm:$0xff]  }
 0x151   :  { %1733 = vmatprep.subr.bf16.mxu0 %v1818_v7 }
 0x152   :  { %v2459_v12 = vpop.f32.mrf.mxu0  ;;  %1734 = vmatpush3.bf16.msra.mxu0 %v1818_v7 }
 0x153   :  { %v823_v17 = vpack.c.bf16 %v2459_v12, %v2454_v8  ;;  %1735 = vmatprep.subr.bf16.mxu0 %v1819_v9 }
 0x154   :  { %v2461_v13 = vpop.f32.mrf.mxu0 }
 0x155   :  { %v822_v14 = vpack.c.bf16 %v2461_v13, %v2457_v11 }
 0x156   :  { %v2467_v18 = vpop.f32.mrf.mxu0  ;;  %1736 = vmatpush3.bf16.msra.mxu0 %v1819_v9 }
 0x157   :  { %1689 = vmatprep.mubr.bf16.mxu0 %v822_v14  ;;  %1737 = vmatprep.subr.bf16.mxu0 %v1820_v10  ;;  %v1822_v14 = vld [vmem:[%s2786_s7 + $0x18] sm:$0xff]  }
 0x158   :  { %v2469_v20 = vpop.f32.mrf.mxu0  ;;  %1690 = vmatmul.mubr.bf16.gmra.mxu0 %v823_v17 }
 0x15a   :  { %v2471_v50 = vpop.f32.mrf.mxu0  ;;  %1738 = vmatpush3.bf16.msra.mxu0 %v1820_v10 }
 0x15b   :  { %v825_v6 = vpack.c.bf16 %v2471_v50, %v2467_v18  ;;  %1739 = vmatprep.subr.bf16.mxu0 %v1821_v24 }
 0x15c   :  { %v2473_v60 = vpop.f32.mrf.mxu0 }
 0x15d   :  { %v824_v5 = vpack.c.bf16 %v2473_v60, %v2469_v20 }
 0x15e   :  { %v2479_v21 = vpop.f32.mrf.mxu0  ;;  %1740 = vmatpush3.bf16.msra.mxu0 %v1821_v24 }
 0x15f   :  { %1693 = vmatprep.mubr.bf16.mxu0 %v824_v5  ;;  %1741 = vmatprep.subr.bf16.mxu0 %v1822_v14 }
 0x160   :  { %v2481_v23 = vpop.f32.mrf.mxu0  ;;  %1694 = vmatmul.mubr.bf16.gmra.mxu0 %v825_v6 }
 0x162   :  { %v2483_v25 = vpop.f32.mrf.mxu0  ;;  %1742 = vmatpush3.bf16.msra.mxu0 %v1822_v14 }
 0x163   :  { %v827_v28 = vpack.c.bf16 %v2483_v25, %v2479_v21 }
 0x164   :  { %v2485_v16 = vpop.f32.mrf.mxu0 }
 0x165   :  { %v826_v26 = vpack.c.bf16 %v2485_v16, %v2481_v23 }
 0x167   :  { %1697 = vmatprep.mubr.bf16.mxu0 %v826_v26 }
 0x168   :  { %1698 = vmatmul.mubr.bf16.gmra.mxu0 %v827_v28 }
 0x180   :  { %v1655_v42 = vpop.f32.mrf.mxu1 }
 0x181   :  { %v782_v45 = vmul.f32 %v1655_v42, %v762_v40 }
 0x182   :  { %v596_v47 = vpop.f32.mrf.mxu1 }
 0x183   :  { %v798_v52 = vmul.f32 %v782_v45, %v2491_v46  ;;  %v780_v55 = vmul.f32 %v760_v48, %v596_v47  ;;  %v732_v45 = vmax.f32 %v2527_v31, 1.0  ;;  %v2541_v47 = vpop.xlane.xlu0 %677  ;;  %v2543_v48 = vpop.xlane.xlu1 %675 }
 0x184   :  { %v1656_v53 = vpop.f32.mrf.mxu1  ;;  %vm721_vm3 = vcmp.gt.f32.partialorder %v2541_v47, 0.0  ;;  %vm720_vm9 = vcmp.gt.f32.partialorder %v2543_v48, 0.0 }
 0x185   :  { %v783_v56 = vmul.f32 %v1656_v53, %v763_v51  ;;  %v796_v0 = vmul.f32 %v780_v55, %v2491_v46  ;;  %1838 = vrsqrt.f32 %v732_v45  ;;  %v735_v53 = vmax.f32 %v2531_v35, 1.0 }
 0x186   :  { %v599_v57 = vpop.f32.mrf.mxu1 }
 0x187   :  { %v799_v61 = vmul.f32 %v783_v56, %v2491_v46  ;;  %v781_v62 = vmul.f32 %v761_v54, %v599_v57  ;;  %v737_v54 = vmax.f32 %v2541_v47, 1.0  ;;  %v2547_v55 = vpop.xlane.xlu0 %681  ;;  %1840 = vrsqrt.f32 %v735_v53 }
 0x188   :  { %v2529_v32 = vpop.f32.mrf.mxu1  ;;  %v739_v10 = vmax.f32 %v2547_v55, 1.0  ;;  %vm723_vm0 = vcmp.gt.f32.partialorder %v2547_v55, 0.0 }
 0x189   :  { %v2496_v1 = vpack.c.bf16 %v799_v61, %v798_v52  ;;  %v797_v3 = vmul.f32 %v781_v62, %v2491_v46  ;;  %v734_v61 = vmax.f32 %v2535_v38, 1.0  ;;  %v736_v62 = vmax.f32 %v2543_v48, 1.0 }
 0x18a   :  { %v2533_v36 = vpop.f32.mrf.mxu1  ;;  %1842 = vrsqrt.f32 %v737_v54 }
 0x18b   :  { %v2499_v4 = vpack.c.bf16 %v797_v3, %v796_v0  ;;  %v2553_v0 = vpop.xlane.xlu1 %679  ;;  %1844 = vrsqrt.f32 %v734_v61  ;;  %v2557_v9 = vpop.xlane.xlu0 %685 }
 0x18c   :  { %v2538_v42 = vpop.f32.mrf.mxu1  ;;  %1846 = vrsqrt.f32 %v736_v62  ;;  %v741_v14 = vmax.f32 %v2557_v9, 1.0  ;;  %vm725_vm6 = vcmp.gt.f32.partialorder %v2557_v9, 0.0  ;;  %vm722_vm12 = vcmp.gt.f32.partialorder %v2553_v0, 0.0 }
 0x18d   :  { %1717 = vmatprep.mubr.bf16.mxu1 %v2499_v4  ;;  %1848 = vrsqrt.f32 %v739_v10 }
 0x18e   :  { %v615_v51 = vpop.f32.mrf.mxu1  ;;  %1850 = vrsqrt.f32 %v741_v14 }
 0x18f   :  { %v2560_v24 = vpop.xlane.xlu1 %683 }
 0x190   :  { %v2549_v56 = vpop.f32.mrf.mxu1  ;;  %vm724_vm15 = vcmp.gt.f32.partialorder %v2560_v24, 0.0 }
 0x192   :  { %v2555_v3 = vpop.f32.mrf.mxu1 }
 0x210   :  { %v2517_v17 = vpop.f32.mrf.mxu0 }
 0x212   :  { %v2519_v19 = vpop.f32.mrf.mxu0 }
 0x214   :  { %v2521_v59 = vpop.f32.mrf.mxu0 }
 0x216   :  { %v2523_v5 = vpop.f32.mrf.mxu0 }
 0x218   :  { %v1691_v6 = vpop.f32.mrf.mxu0 }
 0x21a   :  { %v942_v22 = vpop.f32.mrf.mxu0 }
 0x21c   :  { %v1692_v15 = vpop.f32.mrf.mxu0 }
 0x21d   :  { %v992_v7 = vpack.c.bf16 %v1692_v15, %v1691_v6  ;;  %v738_v6 = vmax.f32 %v2553_v0, 1.0  ;;  %v740_v15 = vmax.f32 %v2560_v24, 1.0 }
 0x21e   :  { %v945_v49 = vpop.f32.mrf.mxu0 }
 0x21f   :  { %1852 = vrsqrt.f32 %v738_v6 }
 0x220   :  { %v1695_v26 = vpop.f32.mrf.mxu0  ;;  %1854 = vrsqrt.f32 %v740_v15 }
 0x222   :  { %v958_v27 = vpop.f32.mrf.mxu0 }
 0x224   :  { %v1696_v28 = vpop.f32.mrf.mxu0 }
 0x225   :  { %v994_v52 = vpack.c.bf16 %v1696_v28, %v1695_v26  ;;  %v2563_v26 = vpop.f32.mrf.mxu1  ;;  %v1837_v28 = vpop.eup %1836 }
 0x226   :  { %v961_v30 = vpop.f32.mrf.mxu0 }
 0x227   :  { %v993_v57 = vpack.c.bf16 %v961_v30, %v958_v27  ;;  %v991_v27 = vpack.c.bf16 %v945_v49, %v942_v22  ;;  %v1839_v30 = vpop.eup %1838  ;;  %v990_v22 = vpack.c.bf16 %v2521_v59, %v2517_v17  ;;  %v2573_v49 = vpop.xlane.xlu1 %687 }
 0x228   :  { %v1699_v33 = vpop.f32.mrf.mxu0  ;;  %v764_v29 = vsel %vm716_vm14, %v1839_v30, 0.0  ;;  %v1841_v31 = vpop.eup %1840  ;;  %v742_v17 = vmax.f32 %v2573_v49, 1.0  ;;  %vm726_vm5 = vcmp.gt.f32.partialorder %v2573_v49, 0.0 }
 0x229   :  { %v1843_v45 = vpop.eup %1842  ;;  %v784_v59 = vmul.f32 %v764_v29, %v2533_v36  ;;  %v767_v35 = vsel %vm719_vm1, %v1841_v31, 0.0 }
 0x22a   :  { %v974_v34 = vpop.f32.mrf.mxu0  ;;  %v787_v36 = vmul.f32 %v2538_v42, %v767_v35 }
 0x22b   :  { %v800_v54 = vmul.f32 %v784_v59, %v2491_v46 }
 0x22c   :  { %v1700_v37 = vpop.f32.mrf.mxu0 }
 0x22d   :  { %v996_v39 = vpack.c.bf16 %v1700_v37, %v1699_v33  ;;  %v2569_v33 = vpop.xlane.xlu0 %689  ;;  %v631_v37 = vpop.f32.mrf.mxu1 }
 0x22e   :  { %v977_v40 = vpop.f32.mrf.mxu0  ;;  %vm727_vm2 = vcmp.gt.f32.partialorder %v2569_v33, 0.0 }
 0x22f   :  { %v995_v43 = vpack.c.bf16 %v977_v40, %v974_v34  ;;  %1701 = vmatprep.subr.bf16.mxu1 %v996_v39  ;;  %v765_v34 = vsel %vm717_vm13, %v1837_v28, 0.0  ;;  %v2577_v41 = vpop.f32.mrf.mxu1 }
 0x230   :  { %1702 = vmatpush3.bf16.msra.mxu1 %v996_v39  ;;  %v743_v39 = vmax.f32 %v2569_v33, 1.0  ;;  %v785_v40 = vmul.f32 %v765_v34, %v615_v51 }
 0x231   :  { %1703 = vmatprep.subr.bf16.mxu1 %v995_v43 }
 0x232   :  { %1856 = vrsqrt.f32 %v743_v39  ;;  %v801_v53 = vmul.f32 %v785_v40, %v2491_v46 }
 0x233   :  { %1858 = vrsqrt.f32 %v742_v17 }
 0x234   :  { %1704 = vmatpush3.bf16.msra.mxu1 %v995_v43  ;;  %v989_v43 = vpack.c.bf16 %v2523_v5, %v2519_v19  ;;  %v769_v19 = vsel %vm721_vm3, %v1843_v45, 0.0  ;;  %v644_v5 = vpop.f32.mrf.mxu1  ;;  %v2589_v38 = vpack.c.bf16 %v801_v53, %v800_v54  ;;  %v1499_v54 = vld [vmem:[%s2787_s6] ss:$0 sm:$0xff] }
 0x235   :  { %1705 = vmatprep.subr.bf16.mxu1 %v994_v52  ;;  %v789_v61 = vmul.f32 %v769_v19, %v631_v37 }
 0x238   :  { %1706 = vmatpush3.bf16.msra.mxu1 %v994_v52  ;;  %v1845_v52 = vpop.eup %1844 }
 0x239   :  { %1707 = vmatprep.subr.bf16.mxu1 %v993_v57  ;;  %v1847_v51 = vpop.eup %1846  ;;  %v766_v47 = vsel %vm718_vm4, %v1845_v52, 0.0 }
 0x23a   :  { %v1849_v62 = vpop.eup %1848  ;;  %v786_v48 = vmul.f32 %v2529_v32, %v766_v47  ;;  %v805_v32 = vmul.f32 %v789_v61, %v2491_v46 }
 0x23b   :  { %v1851_v10 = vpop.eup %1850  ;;  %v771_v55 = vsel %vm723_vm0, %v1849_v62, 0.0 }
 0x23c   :  { %1708 = vmatpush3.bf16.msra.mxu1 %v993_v57  ;;  %v768_v57 = vsel %vm720_vm9, %v1847_v51, 0.0  ;;  %v1853_v42 = vpop.eup %1852  ;;  %v802_v6 = vmul.f32 %v786_v48, %v2491_v46  ;;  %v773_v30 = vsel %vm725_vm6, %v1851_v10, 0.0  ;;  %v791_v34 = vmul.f32 %v2563_v26, %v771_v55 }
 0x23d   :  { %1709 = vmatprep.subr.bf16.mxu1 %v992_v7  ;;  %v788_v14 = vmul.f32 %v768_v57, %v2555_v3  ;;  %v1855_v28 = vpop.eup %1854  ;;  %v770_v9 = vsel %vm722_vm12, %v1853_v42, 0.0 }
 0x23e   :  { %v772_v37 = vsel %vm724_vm15, %v1855_v28, 0.0  ;;  %v790_v24 = vmul.f32 %v2549_v56, %v770_v9  ;;  %v807_v26 = vmul.f32 %v791_v34, %v2491_v46 }
 0x23f   :  { %v804_v3 = vmul.f32 %v788_v14, %v2491_v46  ;;  %v1857_v39 = vpop.eup %1856  ;;  %v792_v40 = vmul.f32 %v772_v37, %v644_v5  ;;  %v1823_v5 = vld [vmem:[%s2786_s7 + $0x10] sm:$0xff]  }
 0x240   :  { %1710 = vmatpush3.bf16.msra.mxu1 %v992_v7  ;;  %v1668_v7 = vpop.f32.mrf.mxu1  ;;  %v1859_v31 = vpop.eup %1858  ;;  %v806_v17 = vmul.f32 %v790_v24, %v2491_v46  ;;  %1743 = vmatprep.subr.bf16.mxu0 %v1823_v5 }
 0x241   :  { %1711 = vmatprep.subr.bf16.mxu1 %v991_v27  ;;  %v2606_v29 = vpack.c.bf16 %v805_v32, %v804_v3  ;;  %v774_v59 = vsel %vm726_vm5, %v1859_v31, 0.0  ;;  %v808_v33 = vmul.f32 %v792_v40, %v2491_v46  ;;  %1744 = vmatpush3.bf16.msra.mxu0 %v1823_v5 }
 0x242   :  { %v647_v15 = vpop.f32.mrf.mxu1  ;;  %v2617_v56 = vpack.c.bf16 %v807_v26, %v806_v17  ;;  %v794_v35 = vmul.f32 %v2577_v41, %v774_v59  ;;  %v1824_v41 = vld [vmem:[%s2786_s7 + $0x8] sm:$0xff]  }
 0x243   :  { %v793_v0 = vmul.f32 %v773_v30, %v647_v15  ;;  %1745 = vmatprep.subr.bf16.mxu0 %v1824_v41 }
 0x244   :  { %1712 = vmatpush3.bf16.msra.mxu1 %v991_v27  ;;  %v803_v27 = vmul.f32 %v787_v36, %v2491_v46  ;;  %v810_v53 = vmul.f32 %v794_v35, %v2491_v46 }
 0x245   :  { %1713 = vmatprep.subr.bf16.mxu1 %v990_v22  ;;  %v809_v45 = vmul.f32 %v793_v0, %v2491_v46  ;;  %1746 = vmatpush3.bf16.msra.mxu0 %v1824_v41 }
 0x247   :  { %v2619_v51 = vpack.c.bf16 %v809_v45, %v808_v33 }
 0x248   :  { %1714 = vmatpush3.bf16.msra.mxu1 %v990_v22  ;;  %v2604_v22 = vpack.c.bf16 %v803_v27, %v802_v6 }
 0x249   :  { %1715 = vmatprep.subr.bf16.mxu1 %v989_v43 }
 0x24c   :  { %1716 = vmatpush3.bf16.msra.mxu1 %v989_v43  ;;  %v775_v43 = vsel %vm727_vm2, %v1857_v39, 0.0 }
 0x24d   :  { %v795_v52 = vmul.f32 %v1668_v7, %v775_v43 }
 0x24f   :  { %1718 = vmatmul.mubr.bf16.vlgmr.msra.gmra.mxu1 %v2496_v1  ;;  %v811_v49 = vmul.f32 %v795_v52, %v2491_v46  ;;  %v1825_v46 = vld [vmem:[%s2786_s7] sm:$0xff]  }
 0x250   :  { %1721 = vmatprep.mubr.bf16.mxu1 %v2589_v38  ;;  %1747 = vmatprep.subr.bf16.mxu0 %v1825_v46 }
 0x251   :  { %v2626_v19 = vpack.c.bf16 %v811_v49, %v810_v53  ;;  %1748 = vmatpush3.bf16.msra.mxu0 %v1825_v46 }
 0x257   :  { %1722 = vmatmul.mubr.bf16.gmra.mxu1 %v2604_v22 }
 0x258   :  { %1725 = vmatprep.mubr.bf16.mxu1 %v2606_v29 }
 0x25f   :  { %1726 = vmatmul.mubr.bf16.gmra.mxu1 %v2617_v56 }
 0x260   :  { %1729 = vmatprep.mubr.bf16.mxu1 %v2619_v51 }
 0x267   :  { %1730 = vmatmul.mubr.bf16.gmra.mxu1 %v2626_v19 }
 0x268   :  { %1781 = vmatprep.mubr.bf16.mxu1 %v2499_v4 }
 0x30f   :  { %v1719_v47 = vpop.f32.mrf.mxu1 }
 0x310   :  { %v1047_v62 = vadd.f32 %v1719_v47, %v1499_v54 }
 0x311   :  { %v1038_v4 = vpop.f32.mrf.mxu1 }
 0x312   :  { %v1039_v57 = vadd.f32 %v1499_v54, %v1038_v4  ;;  %v2652_v28 = vadd.f32 %v2439_v58, %v1047_v62 }
 0x313   :  { %v1720_v36 = vpop.f32.mrf.mxu1 }
 0x314   :  { %v1050_v61 = vadd.f32 %v1720_v36, %v1499_v54  ;;  %v2646_v42 = vadd.f32 %v1039_v57, %v2442_v63 }
 0x315   :  { %v1041_v48 = vpop.f32.mrf.mxu1 }
 0x316   :  { %v1042_v7 = vadd.f32 %v1499_v54, %v1041_v48  ;;  %v2643_v10 = vadd.f32 %v2445_v2, %v1050_v61 }
 0x317   :  { %v1723_v14 = vpop.f32.mrf.mxu1 }
 0x318   :  { %v2649_v27 = vadd.f32 %v1042_v7, %v2448_v44  ;;  %v1118_v6 = vpack.c.bf16 %v2643_v10, %v2652_v28  ;;  %v1063_v9 = vadd.f32 %v1723_v14, %v1499_v54 }
 0x319   :  { %v1054_v55 = vpop.f32.mrf.mxu1 }
 0x31a   :  { %v1117_v32 = vpack.c.bf16 %v2649_v27, %v2646_v42  ;;  %v1055_v2 = vadd.f32 %v1499_v54, %v1054_v55  ;;  %v2668_v0 = vadd.f32 %v2454_v8, %v1063_v9 }
 0x31b   :  { %v1724_v15 = vpop.f32.mrf.mxu1 }
 0x31c   :  { %v1066_v30 = vadd.f32 %v1724_v15, %v1499_v54  ;;  %1749 = vmatprep.mubr.bf16.mxu0 %v1117_v32  ;;  %v2662_v34 = vadd.f32 %v1055_v2, %v2457_v11 }
 0x31d   :  { %v1057_v63 = vpop.f32.mrf.mxu1  ;;  %1750 = vmatmul.mubr.bf16.vlgmr.msra.gmra.mxu0 %v1118_v6 }
 0x31e   :  { %v1058_v3 = vadd.f32 %v1499_v54, %v1057_v63  ;;  %v2659_v44 = vadd.f32 %v2459_v12, %v1066_v30 }
 0x31f   :  { %v1727_v58 = vpop.f32.mrf.mxu1 }
 0x320   :  { %v2665_v37 = vadd.f32 %v1058_v3, %v2461_v13  ;;  %v1120_v31 = vpack.c.bf16 %v2659_v44, %v2668_v0  ;;  %v1079_v43 = vadd.f32 %v1727_v58, %v1499_v54 }
 0x321   :  { %v1070_v39 = vpop.f32.mrf.mxu1 }
 0x322   :  { %v1119_v24 = vpack.c.bf16 %v2665_v37, %v2662_v34  ;;  %v1071_v12 = vadd.f32 %v1499_v54, %v1070_v39  ;;  %v2684_v33 = vadd.f32 %v2467_v18, %v1079_v43 }
 0x323   :  { %v1728_v40 = vpop.f32.mrf.mxu1 }
 0x324   :  { %v1082_v26 = vadd.f32 %v1728_v40, %v1499_v54  ;;  %1753 = vmatprep.mubr.bf16.mxu0 %v1119_v24  ;;  %v2678_v17 = vadd.f32 %v1071_v12, %v2469_v20  ;;  %v1508_v12 = vld [vmem:[%s2788_s8] ss:$0 sm:$0xff] }
 0x325   :  { %v1073_v11 = vpop.f32.mrf.mxu1  ;;  %1754 = vmatmul.mubr.bf16.gmra.mxu0 %v1120_v31 }
 0x326   :  { %v1074_v45 = vadd.f32 %v1499_v54, %v1073_v11  ;;  %v2675_v13 = vadd.f32 %v2471_v50, %v1082_v26 }
 0x327   :  { %v1731_v8 = vpop.f32.mrf.mxu1 }
 0x328   :  { %v2681_v59 = vadd.f32 %v1074_v45, %v2473_v60  ;;  %v1122_v53 = vpack.c.bf16 %v2675_v13, %v2684_v33  ;;  %v1095_v41 = vadd.f32 %v1731_v8, %v1499_v54 }
 0x329   :  { %v1086_v52 = vpop.f32.mrf.mxu1 }
 0x32a   :  { %v1121_v35 = vpack.c.bf16 %v2681_v59, %v2678_v17  ;;  %v1087_v50 = vadd.f32 %v1499_v54, %v1086_v52  ;;  %v2700_v4 = vadd.f32 %v2479_v21, %v1095_v41 }
 0x32b   :  { %v1732_v49 = vpop.f32.mrf.mxu1 }
 0x32c   :  { %v1098_v5 = vadd.f32 %v1732_v49, %v1499_v54  ;;  %1757 = vmatprep.mubr.bf16.mxu0 %v1121_v35  ;;  %v2694_v18 = vadd.f32 %v1087_v50, %v2481_v23 }
 0x32d   :  { %v1089_v20 = vpop.f32.mrf.mxu1  ;;  %1758 = vmatmul.mubr.bf16.gmra.mxu0 %v1122_v53 }
 0x32e   :  { %v1090_v46 = vadd.f32 %v1499_v54, %v1089_v20  ;;  %v2691_v60 = vadd.f32 %v2483_v25, %v1098_v5 }
 0x330   :  { %v2697_v47 = vadd.f32 %v1090_v46, %v2485_v16  ;;  %v1124_v57 = vpack.c.bf16 %v2691_v60, %v2700_v4 }
 0x332   :  { %v1123_v36 = vpack.c.bf16 %v2697_v47, %v2694_v18 }
 0x334   :  { %1761 = vmatprep.mubr.bf16.mxu0 %v1123_v36 }
 0x335   :  { %1762 = vmatmul.mubr.bf16.gmra.mxu0 %v1124_v57 }
 0x3dd   :  { %v1751_v54 = vpop.f32.mrf.mxu0 }
 0x3df   :  { %v1223_v25 = vpop.f32.mrf.mxu0 }
 0x3e1   :  { %v1752_v61 = vpop.f32.mrf.mxu0 }
 0x3e2   :  { %v1287_v40 = vpack.c.bf16 %v1752_v61, %v1751_v54 }
 0x3e3   :  { %v1226_v62 = vpop.f32.mrf.mxu0 }
 0x3e4   :  { %v1286_v31 = vpack.c.bf16 %v1226_v62, %v1223_v25 }
 0x3e5   :  { %v1755_v23 = vpop.f32.mrf.mxu0 }
 0x3e7   :  { %v1239_v48 = vpop.f32.mrf.mxu0 }
 0x3e9   :  { %v1756_v7 = vpop.f32.mrf.mxu0 }
 0x3ea   :  { %v1289_v39 = vpack.c.bf16 %v1756_v7, %v1755_v23 }
 0x3eb   :  { %v1242_v16 = vpop.f32.mrf.mxu0 }
 0x3ec   :  { %v1288_v24 = vpack.c.bf16 %v1242_v16, %v1239_v48 }
 0x3ed   :  { %v1759_v14 = vpop.f32.mrf.mxu0 }
 0x3ef   :  { %v1255_v55 = vpop.f32.mrf.mxu0 }
 0x3f1   :  { %v1760_v21 = vpop.f32.mrf.mxu0 }
 0x3f2   :  { %v1291_v3 = vpack.c.bf16 %v1760_v21, %v1759_v14 }
 0x3f3   :  { %v1258_v32 = vpop.f32.mrf.mxu0 }
 0x3f4   :  { %v1290_v58 = vpack.c.bf16 %v1258_v32, %v1255_v55 }
 0x3f5   :  { %v1763_v6 = vpop.f32.mrf.mxu0 }
 0x3f7   :  { %v1271_v15 = vpop.f32.mrf.mxu0 }
 0x3f9   :  { %v1764_v2 = vpop.f32.mrf.mxu0 }
 0x3fa   :  { %v1293_v30 = vpack.c.bf16 %v1764_v2, %v1763_v6 }
 0x3fb   :  { %v1274_v9 = vpop.f32.mrf.mxu0 }
 0x3fc   :  { %v1292_v63 = vpack.c.bf16 %v1274_v9, %v1271_v15  ;;  %1765 = vmatprep.subr.bf16.mxu1 %v1293_v30 }
 0x3fd   :  { %1766 = vmatpush3.bf16.msra.mxu1 %v1293_v30 }
 0x3fe   :  { %1767 = vmatprep.subr.bf16.mxu1 %v1292_v63 }
 0x401   :  { %1768 = vmatpush3.bf16.msra.mxu1 %v1292_v63 }
 0x402   :  { %1769 = vmatprep.subr.bf16.mxu1 %v1291_v3 }
 0x405   :  { %1770 = vmatpush3.bf16.msra.mxu1 %v1291_v3 }
 0x406   :  { %1771 = vmatprep.subr.bf16.mxu1 %v1290_v58 }
 0x409   :  { %1772 = vmatpush3.bf16.msra.mxu1 %v1290_v58 }
 0x40a   :  { %1773 = vmatprep.subr.bf16.mxu1 %v1289_v39 }
 0x40d   :  { %1774 = vmatpush3.bf16.msra.mxu1 %v1289_v39 }
 0x40e   :  { %1775 = vmatprep.subr.bf16.mxu1 %v1288_v24 }
 0x411   :  { %1776 = vmatpush3.bf16.msra.mxu1 %v1288_v24 }
 0x412   :  { %1777 = vmatprep.subr.bf16.mxu1 %v1287_v40 }
 0x415   :  { %1778 = vmatpush3.bf16.msra.mxu1 %v1287_v40 }
 0x416   :  { %1779 = vmatprep.subr.bf16.mxu1 %v1286_v31 }
 0x419   :  { %1780 = vmatpush3.bf16.msra.mxu1 %v1286_v31 }
 0x41c   :  { %1782 = vmatmul.mubr.bf16.vlgmr.msra.gmra.mxu1 %v2496_v1 }
 0x41d   :  { %1785 = vmatprep.mubr.bf16.mxu1 %v2589_v38 }
 0x424   :  { %1786 = vmatmul.mubr.bf16.gmra.mxu1 %v2604_v22 }
 0x425   :  { %1789 = vmatprep.mubr.bf16.mxu1 %v2606_v29 }
 0x42c   :  { %1790 = vmatmul.mubr.bf16.gmra.mxu1 %v2617_v56 }
 0x42d   :  { %1793 = vmatprep.mubr.bf16.mxu1 %v2619_v51 }
 0x434   :  { %1794 = vmatmul.mubr.bf16.gmra.mxu1 %v2626_v19 }
 0x4dc   :  { %v1783_v26 = vpop.f32.mrf.mxu1 }
 0x4dd   :  { %v1344_v43 = vadd.f32 %v1783_v26, %v1508_v12 }
 0x4de   :  { %v1335_v11 = vpop.f32.mrf.mxu1 }
 0x4df   :  { %v1400_v1 = vadd.f32 %v1344_v43, %v2652_v28  ;;  %v1336_v38 = vadd.f32 %v1508_v12, %v1335_v11 }
 0x4e0   :  { %v1784_v45 = vpop.f32.mrf.mxu1 }
 0x4e1   :  { %1416 = vst [vmem:[%s2789_s9 + $0x10] sm:$0xff] %v1400_v1  ;;  %v1398_v22 = vadd.f32 %v1336_v38, %v2646_v42  ;;  %v1347_v29 = vadd.f32 %v1784_v45, %v1508_v12 }
 0x4e2   :  { %v1338_v56 = vpop.f32.mrf.mxu1 }
 0x4e3   :  { %1414 = vst [vmem:[%s2789_s9] sm:$0xff] %v1398_v22  ;;  %v1401_v51 = vadd.f32 %v1347_v29, %v2643_v10  ;;  %v1339_v19 = vadd.f32 %v1508_v12, %v1338_v56 }
 0x4e4   :  { %v1787_v8 = vpop.f32.mrf.mxu1 }
 0x4e5   :  { %1417 = vst [vmem:[%s2789_s9 + $0x18] sm:$0xff] %v1401_v51  ;;  %v1399_v28 = vadd.f32 %v1339_v19, %v2649_v27  ;;  %v1360_v52 = vadd.f32 %v1787_v8, %v1508_v12 }
 0x4e6   :  { %v1351_v35 = vpop.f32.mrf.mxu1 }
 0x4e7   :  { %1415 = vst [vmem:[%s2789_s9 + $0x8] sm:$0xff] %v1399_v28  ;;  %v1404_v42 = vadd.f32 %v1360_v52, %v2668_v0  ;;  %v1352_v49 = vadd.f32 %v1508_v12, %v1351_v35 }
 0x4e8   :  { %v1788_v53 = vpop.f32.mrf.mxu1 }
 0x4e9   :  { %1420 = vst [vmem:[%s2789_s9 + $0x30] sm:$0xff] %v1404_v42  ;;  %v1402_v10 = vadd.f32 %v1352_v49, %v2662_v34  ;;  %v1363_v50 = vadd.f32 %v1788_v53, %v1508_v12 }
 0x4ea   :  { %v1354_v5 = vpop.f32.mrf.mxu1 }
 0x4eb   :  { %1418 = vst [vmem:[%s2789_s9 + $0x20] sm:$0xff] %v1402_v10  ;;  %v1405_v27 = vadd.f32 %v1363_v50, %v2659_v44  ;;  %v1355_v41 = vadd.f32 %v1508_v12, %v1354_v5 }
 0x4ec   :  { %v1791_v20 = vpop.f32.mrf.mxu1 }
 0x4ed   :  { %1421 = vst [vmem:[%s2789_s9 + $0x38] sm:$0xff] %v1405_v27  ;;  %v1403_v0 = vadd.f32 %v1355_v41, %v2665_v37  ;;  %v1376_v46 = vadd.f32 %v1791_v20, %v1508_v12 }
 0x4ee   :  { %v1367_v36 = vpop.f32.mrf.mxu1 }
 0x4ef   :  { %1419 = vst [vmem:[%s2789_s9 + $0x28] sm:$0xff] %v1403_v0  ;;  %v1408_v34 = vadd.f32 %v1376_v46, %v2684_v33  ;;  %v1368_v57 = vadd.f32 %v1508_v12, %v1367_v36 }
 0x4f0   :  { %v1792_v54 = vpop.f32.mrf.mxu1 }
 0x4f1   :  { %1424 = vst [vmem:[%s2789_s9 + $0x50] sm:$0xff] %v1408_v34  ;;  %v1406_v44 = vadd.f32 %v1368_v57, %v2678_v17  ;;  %v1379_v25 = vadd.f32 %v1792_v54, %v1508_v12 }
 0x4f2   :  { %v1370_v61 = vpop.f32.mrf.mxu1 }
 0x4f3   :  { %1422 = vst [vmem:[%s2789_s9 + $0x40] sm:$0xff] %v1406_v44  ;;  %v1409_v37 = vadd.f32 %v1379_v25, %v2675_v13  ;;  %v1371_v62 = vadd.f32 %v1508_v12, %v1370_v61 }
 0x4f4   :  { %v1795_v23 = vpop.f32.mrf.mxu1 }
 0x4f5   :  { %1425 = vst [vmem:[%s2789_s9 + $0x58] sm:$0xff] %v1409_v37  ;;  %v1407_v33 = vadd.f32 %v1371_v62, %v2681_v59  ;;  %v1392_v48 = vadd.f32 %v1795_v23, %v1508_v12 }
 0x4f6   :  { %v1383_v7 = vpop.f32.mrf.mxu1 }
 0x4f7   :  { %1423 = vst [vmem:[%s2789_s9 + $0x48] sm:$0xff] %v1407_v33  ;;  %v1412_v17 = vadd.f32 %v1392_v48, %v2700_v4  ;;  %v1384_v16 = vadd.f32 %v1508_v12, %v1383_v7 }
 0x4f8   :  { %v1796_v14 = vpop.f32.mrf.mxu1 }
 0x4f9   :  { %1428 = vst [vmem:[%s2789_s9 + $0x70] sm:$0xff] %v1412_v17  ;;  %v1410_v13 = vadd.f32 %v1384_v16, %v2694_v18  ;;  %v1395_v55 = vadd.f32 %v1796_v14, %v1508_v12 }
 0x4fa   :  { %v1386_v21 = vpop.f32.mrf.mxu1 }
 0x4fb   :  { %1426 = vst [vmem:[%s2789_s9 + $0x60] sm:$0xff] %v1410_v13  ;;  %v1413_v59 = vadd.f32 %v1395_v55, %v2691_v60  ;;  %v1387_v32 = vadd.f32 %v1508_v12, %v1386_v21 }
 0x4fd   :  { %1429 = vst [vmem:[%s2789_s9 + $0x78] sm:$0xff] %v1413_v59  ;;  %v1411_v4 = vadd.f32 %v1387_v32, %v2697_v47 }
 0x4ff   :  { %1427 = vst [vmem:[%s2789_s9 + $0x68] sm:$0xff] %v1411_v4 }

</bundles_post_ra>
